<compile_context>
chip_gen: v7x
topology: tpu7x:2x2x1
jax: 0.10.0
libtpu: 0.0.40
codegen_flags: <defaults>
</compile_context>

<pallas_src>
import functools

import jax
import jax.numpy as jnp
from jax import lax
from jax.experimental import pallas as pl
from jax.experimental.pallas import tpu as pltpu

_LANE = 128


def _round_up(x, m):
    return ((x + m - 1) // m) * m


def _dsconv_kernel(x_ref, halo_ref, wf_ref, o_ref, xs_ref, *,
                   tile_h, W, Cp, OCp, K, dil, hb):
    """One (batch, row-tile) grid step.

    x_ref   : (1, tile_h, Wp, Cp)   padded-input rows [i*tile_h, (i+1)*tile_h)
    halo_ref: (1, hb,     Wp, Cp)   the 2*pad rows directly below the tile
    wf_ref  : (K*K, Cp, OCp)        fused depthwise*pointwise weights
    o_ref   : (1, tile_h, W, OCp)
    xs_ref  : (tile_h + hb, Wp, Cp) VMEM scratch: tile + halo stitched together
    """
    # Stitch main tile + halo into one contiguous row range (static offsets).
    xs_ref[pl.ds(0, tile_h), :, :] = x_ref[0]
    xs_ref[pl.ds(tile_h, hb), :, :] = halo_ref[0]

    acc = jnp.zeros((tile_h * W, OCp), jnp.float32)
    # K*K shifted views, each contributing one MXU matmul (contraction = Cp).
    # Static Python loop -> fully unrolled, LLO scheduler sees everything.
    for kh in range(K):
        for kw in range(K):
            tap = xs_ref[pl.ds(kh * dil, tile_h), pl.ds(kw * dil, W), :]
            acc = acc + jnp.dot(tap.reshape(tile_h * W, Cp),
                                wf_ref[kh * K + kw],
                                preferred_element_type=jnp.float32)
    o_ref[0] = acc.reshape(tile_h, W, OCp).astype(o_ref.dtype)


def dsconv_complex(x_nchw, dw_weight, pw_weight, *, ksize=3, stride=1,
                   dilation=1, compute_dtype=jnp.float32):
    """Forward pass of DSConvComplex.

    x_nchw   : (N, C, H, W)           float32
    dw_weight: (C, 1, K, K)           PyTorch depthwise weight layout
    pw_weight: (OC, C, 1, 1)          PyTorch pointwise weight layout
    returns  : (N, OC, H, W)          float32
    """
    assert stride == 1, "kernel implements the module default stride=1"
    assert ksize % 2 == 1 and ksize >= 3, "kernel implements odd ksize >= 3"
    N, C, H, W = x_nchw.shape
    OC = pw_weight.shape[0]
    K, dil = ksize, dilation
    pad = ((K - 1) // 2) * dil
    hb = 2 * pad                       # halo rows below each tile
    Wp = W + 2 * pad

    Cp = _round_up(C, _LANE)
    OCp = _round_up(OC, _LANE)
    in_bytes = jnp.dtype(compute_dtype).itemsize

    # Row-tile size: a multiple of hb, sized so (one input block + one output
    # block) stays around ~4 MiB -> comfortably inside scoped VMEM with double
    # buffering on v5e (16 MiB default) / v6e (32 MiB) / v7x (64 MiB total).
    row_bytes = Wp * Cp * in_bytes + W * OCp * 4
    budget_rows = max(hb, ((4 * 1024 * 1024 // row_bytes) // hb) * hb)
    tile_h = min(_round_up(H, hb), budget_rows)
    n_h = -(-H // tile_h)
    H_out_p = n_h * tile_h
    Hp_full = H_out_p + 2 * pad

    # Glue (one fused XLA layout pass): NCHW -> NHWC, zero-pad the spatial halo
    # and pad channels up to a lane-dense multiple of 128.
    x_nhwc = jnp.transpose(x_nchw, (0, 2, 3, 1)).astype(compute_dtype)
    x_pad = jnp.pad(x_nhwc, ((0, 0),
                             (pad, pad + (H_out_p - H)),
                             (pad, pad),
                             (0, Cp - C)))
    assert x_pad.shape == (N, Hp_full, Wp, Cp)

    # Fold depthwise into pointwise: Wf[kk, c, oc] = dw[c, kk] * pw[oc, c].
    dw = dw_weight[:, 0, :, :].reshape(C, K * K).astype(jnp.float32)   # (C, K*K)
    pw = pw_weight[:, :, 0, 0].astype(jnp.float32)                     # (OC, C)
    wf = jnp.einsum("ck,oc->kco", dw, pw)                              # (K*K, C, OC)
    wf = jnp.pad(wf, ((0, 0), (0, Cp - C), (0, OCp - OC))).astype(compute_dtype)

    # Explicit VMEM budget (pipeline double-buffers each block).
    blk_in = tile_h * Wp * Cp * in_bytes
    blk_halo = hb * Wp * Cp * in_bytes
    blk_out = tile_h * W * OCp * 4
    blk_wf = K * K * Cp * OCp * in_bytes
    scratch_b = (tile_h + hb) * Wp * Cp * in_bytes
    vmem_need = 2 * (blk_in + blk_halo + blk_out + blk_wf) + scratch_b
    vmem_limit = int(min(max(vmem_need * 3 // 2, 16 * 1024 * 1024),
                         48 * 1024 * 1024))

    kernel = functools.partial(_dsconv_kernel, tile_h=tile_h, W=W, Cp=Cp,
                               OCp=OCp, K=K, dil=dil, hb=hb)
    halo_blocks_per_tile = tile_h // hb   # integral: tile_h is a multiple of hb

    out_nhwc = pl.pallas_call(
        kernel,
        out_shape=jax.ShapeDtypeStruct((N, H_out_p, W, OCp), jnp.float32),
        grid_spec=pltpu.PrefetchScalarGridSpec(
            num_scalar_prefetch=0,
            grid=(N, n_h),
            in_specs=[
                # Main tile: rows [i*tile_h, (i+1)*tile_h) of the padded input.
                pl.BlockSpec((1, tile_h, Wp, Cp), lambda n, i: (n, i, 0, 0)),
                # Halo: the 2*pad rows just below the tile (a second Blocked
                # view of the same padded input, so it stays auto-pipelined).
                pl.BlockSpec((1, hb, Wp, Cp),
                             lambda n, i: (n, (i + 1) * halo_blocks_per_tile, 0, 0)),
                # Fused weights, resident across the grid (constant block idx).
                pl.BlockSpec((K * K, Cp, OCp), lambda n, i: (0, 0, 0)),
            ],
            out_specs=pl.BlockSpec((1, tile_h, W, OCp),
                                   lambda n, i: (n, i, 0, 0)),
            scratch_shapes=[pltpu.VMEM((tile_h + hb, Wp, Cp), compute_dtype)],
        ),
        compiler_params=pltpu.CompilerParams(
            dimension_semantics=("parallel", "parallel"),
            vmem_limit_bytes=vmem_limit),
    )(x_pad, x_pad, wf)

    out_nhwc = out_nhwc[:, :H, :, :OC]            # drop row / lane padding
    return jnp.transpose(out_nhwc, (0, 3, 1, 2))  # back to NCHW


def _reference(x_nchw, dw_weight, pw_weight, *, ksize=3, stride=1, dilation=1):
    """Pure-JAX reference matching PyTorch conv semantics (NCHW)."""
    C = x_nchw.shape[1]
    pad = ((ksize - 1) // 2) * dilation
    dn = lax.conv_dimension_numbers(x_nchw.shape, dw_weight.shape,
                                    ("NCHW", "OIHW", "NCHW"))
    dw_out = lax.conv_general_dilated(
        x_nchw, dw_weight, window_strides=(stride, stride),
        padding=((pad, pad), (pad, pad)), rhs_dilation=(dilation, dilation),
        dimension_numbers=dn, feature_group_count=C)
    dn2 = lax.conv_dimension_numbers(dw_out.shape, pw_weight.shape,
                                     ("NCHW", "OIHW", "NCHW"))
    return lax.conv_general_dilated(
        dw_out, pw_weight, window_strides=(1, 1), padding=((0, 0), (0, 0)),
        dimension_numbers=dn2)


if __name__ == "__main__":
    # Small deterministic example: batch=2, in_ch=4, out_ch=8, spatial=16, K=3.
    N, C, OC, H, W, K = 2, 4, 8, 16, 16, 3
    key = jax.random.PRNGKey(0)
    kx, kd, kp = jax.random.split(key, 3)

    x = jax.random.normal(kx, (N, C, H, W), dtype=jnp.float32)
    dw_weight = jax.random.normal(kd, (C, 1, K, K), dtype=jnp.float32) * 0.1
    pw_weight = jax.random.normal(kp, (OC, C, 1, 1), dtype=jnp.float32) * 0.1

    ref = _reference(x, dw_weight, pw_weight, ksize=K, stride=1, dilation=1)

    # f32 MXU operands (exact path).
    out = dsconv_complex(x, dw_weight, pw_weight, ksize=K, stride=1, dilation=1)
    out = jax.block_until_ready(out)
    assert out.shape == ref.shape == (N, OC, H, W)
    assert jnp.allclose(out, ref, atol=1e-4, rtol=1e-4)

    # bf16 MXU operands with f32 accumulation (the fast path on v5e/v6e/v7x).
    out_bf16 = dsconv_complex(x, dw_weight, pw_weight, ksize=K, stride=1,
                              dilation=1, compute_dtype=jnp.bfloat16)
    out_bf16 = jax.block_until_ready(out_bf16)
    assert jnp.allclose(out_bf16, ref, atol=5e-2, rtol=5e-2)

    print("KERNEL_OK")
</pallas_src>

<mosaic_0001>
module attributes {stable_mosaic.version = 11 : i64} {
  func.func @_dsconv_kernel(%arg0: i32, %arg1: i32, %arg2: memref<1x16x18x128xf32, #tpu.memory_space<vmem>>, %arg3: memref<1x2x18x128xf32, #tpu.memory_space<vmem>>, %arg4: memref<9x128x128xf32, #tpu.memory_space<vmem>>, %arg5: memref<1x16x16x128xf32, #tpu.memory_space<vmem>>, %arg6: memref<18x18x128xf32, #tpu.memory_space<vmem>>) attributes {dimension_semantics = [#tpu.dimension_semantics<parallel>, #tpu.dimension_semantics<parallel>], iteration_bounds = array<i64: 2, 1>, scalar_prefetch = 0 : i64, scratch_operands = 1 : i64, tpu.core_type = #tpu.core_type<tc>, window_params = [{transform_indices = @transform_0, window_bounds = array<i64: 1, 16, 18, 128>}, {transform_indices = @transform_1, window_bounds = array<i64: 1, 2, 18, 128>}, {pipeline_mode = #tpu.pipeline_mode<synchronous>, transform_indices = @transform_2, window_bounds = array<i64: 9, 128, 128>}, {transform_indices = @transform_3, window_bounds = array<i64: 1, 16, 16, 128>}]} {
    %c0 = arith.constant 0 : index
    %c0_0 = arith.constant 0 : index
    %c0_1 = arith.constant 0 : index
    %c0_2 = arith.constant 0 : index
    %0 = vector.load %arg2[%c0, %c0_0, %c0_1, %c0_2] : memref<1x16x18x128xf32, #tpu.memory_space<vmem>>, vector<1x16x18x128xf32>
    %1 = vector.shape_cast %0 : vector<1x16x18x128xf32> to vector<16x18x128xf32>
    %c0_3 = arith.constant 0 : index
    %c0_4 = arith.constant 0 : index
    %c0_5 = arith.constant 0 : index
    %2 = vector.load %arg6[%c0_3, %c0_4, %c0_5] : memref<18x18x128xf32, #tpu.memory_space<vmem>>, vector<16x18x128xf32>
    tpu.vector_store %arg6[%c0_3, %c0_4, %c0_5], %1 {strides = array<i32>} : memref<18x18x128xf32, #tpu.memory_space<vmem>>, vector<16x18x128xf32>,
    %c0_6 = arith.constant 0 : index
    %c0_7 = arith.constant 0 : index
    %c0_8 = arith.constant 0 : index
    %c0_9 = arith.constant 0 : index
    %3 = vector.load %arg3[%c0_6, %c0_7, %c0_8, %c0_9] : memref<1x2x18x128xf32, #tpu.memory_space<vmem>>, vector<1x2x18x128xf32>
    %4 = vector.shape_cast %3 : vector<1x2x18x128xf32> to vector<2x18x128xf32>
    %c16 = arith.constant 16 : index
    %c0_10 = arith.constant 0 : index
    %c0_11 = arith.constant 0 : index
    %5 = vector.load %arg6[%c16, %c0_10, %c0_11] : memref<18x18x128xf32, #tpu.memory_space<vmem>>, vector<2x18x128xf32>
    tpu.vector_store %arg6[%c16, %c0_10, %c0_11], %4 {strides = array<i32>} : memref<18x18x128xf32, #tpu.memory_space<vmem>>, vector<2x18x128xf32>,
    %cst = arith.constant 0.000000e+00 : f32
    %6 = vector.broadcast %cst : f32 to vector<256x128xf32>
    %c0_12 = arith.constant 0 : index
    %c0_13 = arith.constant 0 : index
    %c0_14 = arith.constant 0 : index
    %7 = vector.load %arg6[%c0_12, %c0_13, %c0_14] : memref<18x18x128xf32, #tpu.memory_space<vmem>>, vector<16x16x128xf32>
    %8 = vector.shape_cast %7 : vector<16x16x128xf32> to vector<256x128xf32>
    %c0_15 = arith.constant 0 : index
    %c0_16 = arith.constant 0 : index
    %c0_17 = arith.constant 0 : index
    %9 = vector.load %arg4[%c0_15, %c0_16, %c0_17] : memref<9x128x128xf32, #tpu.memory_space<vmem>>, vector<1x128x128xf32>
    %10 = vector.shape_cast %9 : vector<1x128x128xf32> to vector<128x128xf32>
    %cst_18 = arith.constant dense<0.000000e+00> : vector<256x128xf32>
    %11 = tpu.matmul %8, %10, %cst_18 {dimension_numbers = #tpu.dot_dimension_numbers<[1], [0], [0], [1], [0, 0, 1, 1], [], []>} : vector<256x128xf32>, vector<128x128xf32>, vector<256x128xf32> -> vector<256x128xf32>
    %12 = arith.addf %6, %11 : vector<256x128xf32>
    %c0_19 = arith.constant 0 : index
    %c1 = arith.constant 1 : index
    %c0_20 = arith.constant 0 : index
    %13 = vector.load %arg6[%c0_19, %c1, %c0_20] : memref<18x18x128xf32, #tpu.memory_space<vmem>>, vector<16x16x128xf32>
    %14 = vector.shape_cast %13 : vector<16x16x128xf32> to vector<256x128xf32>
    %c1_21 = arith.constant 1 : index
    %c0_22 = arith.constant 0 : index
    %c0_23 = arith.constant 0 : index
    %15 = vector.load %arg4[%c1_21, %c0_22, %c0_23] : memref<9x128x128xf32, #tpu.memory_space<vmem>>, vector<1x128x128xf32>
    %16 = vector.shape_cast %15 : vector<1x128x128xf32> to vector<128x128xf32>
    %cst_24 = arith.constant dense<0.000000e+00> : vector<256x128xf32>
    %17 = tpu.matmul %14, %16, %cst_24 {dimension_numbers = #tpu.dot_dimension_numbers<[1], [0], [0], [1], [0, 0, 1, 1], [], []>} : vector<256x128xf32>, vector<128x128xf32>, vector<256x128xf32> -> vector<256x128xf32>
    %18 = arith.addf %12, %17 : vector<256x128xf32>
    %c0_25 = arith.constant 0 : index
    %c2 = arith.constant 2 : index
    %c0_26 = arith.constant 0 : index
    %19 = vector.load %arg6[%c0_25, %c2, %c0_26] : memref<18x18x128xf32, #tpu.memory_space<vmem>>, vector<16x16x128xf32>
    %20 = vector.shape_cast %19 : vector<16x16x128xf32> to vector<256x128xf32>
    %c2_27 = arith.constant 2 : index
    %c0_28 = arith.constant 0 : index
    %c0_29 = arith.constant 0 : index
    %21 = vector.load %arg4[%c2_27, %c0_28, %c0_29] : memref<9x128x128xf32, #tpu.memory_space<vmem>>, vector<1x128x128xf32>
    %22 = vector.shape_cast %21 : vector<1x128x128xf32> to vector<128x128xf32>
    %cst_30 = arith.constant dense<0.000000e+00> : vector<256x128xf32>
    %23 = tpu.matmul %20, %22, %cst_30 {dimension_numbers = #tpu.dot_dimension_numbers<[1], [0], [0], [1], [0, 0, 1, 1], [], []>} : vector<256x128xf32>, vector<128x128xf32>, vector<256x128xf32> -> vector<256x128xf32>
    %24 = arith.addf %18, %23 : vector<256x128xf32>
    %c1_31 = arith.constant 1 : index
    %c0_32 = arith.constant 0 : index
    %c0_33 = arith.constant 0 : index
    %25 = vector.load %arg6[%c1_31, %c0_32, %c0_33] : memref<18x18x128xf32, #tpu.memory_space<vmem>>, vector<16x16x128xf32>
    %26 = vector.shape_cast %25 : vector<16x16x128xf32> to vector<256x128xf32>
    %c3 = arith.constant 3 : index
    %c0_34 = arith.constant 0 : index
    %c0_35 = arith.constant 0 : index
    %27 = vector.load %arg4[%c3, %c0_34, %c0_35] : memref<9x128x128xf32, #tpu.memory_space<vmem>>, vector<1x128x128xf32>
    %28 = vector.shape_cast %27 : vector<1x128x128xf32> to vector<128x128xf32>
    %cst_36 = arith.constant dense<0.000000e+00> : vector<256x128xf32>
    %29 = tpu.matmul %26, %28, %cst_36 {dimension_numbers = #tpu.dot_dimension_numbers<[1], [0], [0], [1], [0, 0, 1, 1], [], []>} : vector<256x128xf32>, vector<128x128xf32>, vector<256x128xf32> -> vector<256x128xf32>
    %30 = arith.addf %24, %29 : vector<256x128xf32>
    %c1_37 = arith.constant 1 : index
    %c1_38 = arith.constant 1 : index
    %c0_39 = arith.constant 0 : index
    %31 = vector.load %arg6[%c1_37, %c1_38, %c0_39] : memref<18x18x128xf32, #tpu.memory_space<vmem>>, vector<16x16x128xf32>
    %32 = vector.shape_cast %31 : vector<16x16x128xf32> to vector<256x128xf32>
    %c4 = arith.constant 4 : index
    %c0_40 = arith.constant 0 : index
    %c0_41 = arith.constant 0 : index
    %33 = vector.load %arg4[%c4, %c0_40, %c0_41] : memref<9x128x128xf32, #tpu.memory_space<vmem>>, vector<1x128x128xf32>
    %34 = vector.shape_cast %33 : vector<1x128x128xf32> to vector<128x128xf32>
    %cst_42 = arith.constant dense<0.000000e+00> : vector<256x128xf32>
    %35 = tpu.matmul %32, %34, %cst_42 {dimension_numbers = #tpu.dot_dimension_numbers<[1], [0], [0], [1], [0, 0, 1, 1], [], []>} : vector<256x128xf32>, vector<128x128xf32>, vector<256x128xf32> -> vector<256x128xf32>
    %36 = arith.addf %30, %35 : vector<256x128xf32>
    %c1_43 = arith.constant 1 : index
    %c2_44 = arith.constant 2 : index
    %c0_45 = arith.constant 0 : index
    %37 = vector.load %arg6[%c1_43, %c2_44, %c0_45] : memref<18x18x128xf32, #tpu.memory_space<vmem>>, vector<16x16x128xf32>
    %38 = vector.shape_cast %37 : vector<16x16x128xf32> to vector<256x128xf32>
    %c5 = arith.constant 5 : index
    %c0_46 = arith.constant 0 : index
    %c0_47 = arith.constant 0 : index
    %39 = vector.load %arg4[%c5, %c0_46, %c0_47] : memref<9x128x128xf32, #tpu.memory_space<vmem>>, vector<1x128x128xf32>
    %40 = vector.shape_cast %39 : vector<1x128x128xf32> to vector<128x128xf32>
    %cst_48 = arith.constant dense<0.000000e+00> : vector<256x128xf32>
    %41 = tpu.matmul %38, %40, %cst_48 {dimension_numbers = #tpu.dot_dimension_numbers<[1], [0], [0], [1], [0, 0, 1, 1], [], []>} : vector<256x128xf32>, vector<128x128xf32>, vector<256x128xf32> -> vector<256x128xf32>
    %42 = arith.addf %36, %41 : vector<256x128xf32>
    %c2_49 = arith.constant 2 : index
    %c0_50 = arith.constant 0 : index
    %c0_51 = arith.constant 0 : index
    %43 = vector.load %arg6[%c2_49, %c0_50, %c0_51] : memref<18x18x128xf32, #tpu.memory_space<vmem>>, vector<16x16x128xf32>
    %44 = vector.shape_cast %43 : vector<16x16x128xf32> to vector<256x128xf32>
    %c6 = arith.constant 6 : index
    %c0_52 = arith.constant 0 : index
    %c0_53 = arith.constant 0 : index
    %45 = vector.load %arg4[%c6, %c0_52, %c0_53] : memref<9x128x128xf32, #tpu.memory_space<vmem>>, vector<1x128x128xf32>
    %46 = vector.shape_cast %45 : vector<1x128x128xf32> to vector<128x128xf32>
    %cst_54 = arith.constant dense<0.000000e+00> : vector<256x128xf32>
    %47 = tpu.matmul %44, %46, %cst_54 {dimension_numbers = #tpu.dot_dimension_numbers<[1], [0], [0], [1], [0, 0, 1, 1], [], []>} : vector<256x128xf32>, vector<128x128xf32>, vector<256x128xf32> -> vector<256x128xf32>
    %48 = arith.addf %42, %47 : vector<256x128xf32>
    %c2_55 = arith.constant 2 : index
    %c1_56 = arith.constant 1 : index
    %c0_57 = arith.constant 0 : index
    %49 = vector.load %arg6[%c2_55, %c1_56, %c0_57] : memref<18x18x128xf32, #tpu.memory_space<vmem>>, vector<16x16x128xf32>
    %50 = vector.shape_cast %49 : vector<16x16x128xf32> to vector<256x128xf32>
    %c7 = arith.constant 7 : index
    %c0_58 = arith.constant 0 : index
    %c0_59 = arith.constant 0 : index
    %51 = vector.load %arg4[%c7, %c0_58, %c0_59] : memref<9x128x128xf32, #tpu.memory_space<vmem>>, vector<1x128x128xf32>
    %52 = vector.shape_cast %51 : vector<1x128x128xf32> to vector<128x128xf32>
    %cst_60 = arith.constant dense<0.000000e+00> : vector<256x128xf32>
    %53 = tpu.matmul %50, %52, %cst_60 {dimension_numbers = #tpu.dot_dimension_numbers<[1], [0], [0], [1], [0, 0, 1, 1], [], []>} : vector<256x128xf32>, vector<128x128xf32>, vector<256x128xf32> -> vector<256x128xf32>
    %54 = arith.addf %48, %53 : vector<256x128xf32>
    %c2_61 = arith.constant 2 : index
    %c2_62 = arith.constant 2 : index
    %c0_63 = arith.constant 0 : index
    %55 = vector.load %arg6[%c2_61, %c2_62, %c0_63] : memref<18x18x128xf32, #tpu.memory_space<vmem>>, vector<16x16x128xf32>
    %56 = vector.shape_cast %55 : vector<16x16x128xf32> to vector<256x128xf32>
    %c8 = arith.constant 8 : index
    %c0_64 = arith.constant 0 : index
    %c0_65 = arith.constant 0 : index
    %57 = vector.load %arg4[%c8, %c0_64, %c0_65] : memref<9x128x128xf32, #tpu.memory_space<vmem>>, vector<1x128x128xf32>
    %58 = vector.shape_cast %57 : vector<1x128x128xf32> to vector<128x128xf32>
    %cst_66 = arith.constant dense<0.000000e+00> : vector<256x128xf32>
    %59 = tpu.matmul %56, %58, %cst_66 {dimension_numbers = #tpu.dot_dimension_numbers<[1], [0], [0], [1], [0, 0, 1, 1], [], []>} : vector<256x128xf32>, vector<128x128xf32>, vector<256x128xf32> -> vector<256x128xf32>
    %60 = arith.addf %54, %59 : vector<256x128xf32>
    %61 = vector.shape_cast %60 : vector<256x128xf32> to vector<16x16x128xf32>
    %c0_67 = arith.constant 0 : index
    %c0_68 = arith.constant 0 : index
    %c0_69 = arith.constant 0 : index
    %c0_70 = arith.constant 0 : index
    %62 = vector.load %arg5[%c0_67, %c0_68, %c0_69, %c0_70] : memref<1x16x16x128xf32, #tpu.memory_space<vmem>>, vector<1x16x16x128xf32>
    %63 = vector.shape_cast %62 : vector<1x16x16x128xf32> to vector<16x16x128xf32>
    %64 = vector.shape_cast %61 : vector<16x16x128xf32> to vector<1x16x16x128xf32>
    tpu.vector_store %arg5[%c0_67, %c0_68, %c0_69, %c0_70], %64 {strides = array<i32>} : memref<1x16x16x128xf32, #tpu.memory_space<vmem>>, vector<1x16x16x128xf32>,
    return
  }
  func.func @transform_0(%arg0: i32, %arg1: i32) -> (i32, i32, i32, i32) {
    %c0_i32 = arith.constant 0 : i32
    %c0_i32_0 = arith.constant 0 : i32
    %c0_i32_1 = arith.constant 0 : i32
    return %arg0, %arg1, %c0_i32, %c0_i32_0 : i32, i32, i32, i32
  }
  func.func @transform_1(%arg0: i32, %arg1: i32) -> (i32, i32, i32, i32) {
    %c1_i32 = arith.constant 1 : i32
    %0 = arith.addi %arg1, %c1_i32 : i32
    %c8_i32 = arith.constant 8 : i32
    %1 = arith.muli %0, %c8_i32 : i32
    %c0_i32 = arith.constant 0 : i32
    %c0_i32_0 = arith.constant 0 : i32
    %c0_i32_1 = arith.constant 0 : i32
    return %arg0, %1, %c0_i32, %c0_i32_0 : i32, i32, i32, i32
  }
  func.func @transform_2(%arg0: i32, %arg1: i32) -> (i32, i32, i32) {
    %c0_i32 = arith.constant 0 : i32
    %c0_i32_0 = arith.constant 0 : i32
    %c0_i32_1 = arith.constant 0 : i32
    %c0_i32_2 = arith.constant 0 : i32
    return %c0_i32, %c0_i32_0, %c0_i32_1 : i32, i32, i32
  }
  func.func @transform_3(%arg0: i32, %arg1: i32) -> (i32, i32, i32, i32) {
    %c0_i32 = arith.constant 0 : i32
    %c0_i32_0 = arith.constant 0 : i32
    %c0_i32_1 = arith.constant 0 : i32
    return %arg0, %arg1, %c0_i32, %c0_i32_0 : i32, i32, i32, i32
  }
}

</mosaic_0001>

<bundles_post_ra>
// kernel: tpu_custom_call.1
= control target key start
LH: loop header
LB: loop body
LE: loop exit
PB: predicated region body
PF: predicated region fallthrough
CT: control target
= control target key end

     0   :  { %8 = vsyncpa [#allocation4], 0  ;;  %s6332_s0 = inlined_call_operand.vmem [shape: f32[2,18,18,128], index: 0, kind: input, shape index: {}]   ;;  %s6333_s1 = inlined_call_operand.vmem [shape: f32[2,18,18,128], index: 1, kind: input, shape index: {}]   ;;  %s6334_s2 = inlined_call_operand.vmem [shape: f32[9,128,128], index: 2, kind: input, shape index: {}]   ;;  %s6335_s3 = inlined_call_operand.hbm [shape: f32[2,16,16,128], index: 3, kind: output, shape index: {}]  }
   0x1   :  { %10 = vsyncpa [#allocation4 + $0x1], 0  ;;  %s5254_s12 = smov 0   ;;  %s5256_s13 = smov 0  }
   0x2   :  { %s5258_s14 = smov 0   ;;  %s5260_s15 = smov 0  }
   0x3   :  { %s5262_s16 = smov 0   ;;  %s5264_s17 = smov 0  }
   0x4 LB: > { %s3233_s18 = sadd.s32 4294967295, %s5229_s17   ;;  %s3234_s19 = sadd.s32 4294967294, %s5229_s17   ;;  %s5229_s17 = sphi %s5264_s17, %s16_s17   ;;  %s5225_s16 = sphi %s5262_s16, %s6409_s16   ;;  %s5221_s15 = sphi %s5260_s15, %s6408_s15   ;;  %s5217_s14 = sphi %s5258_s14, %s6407_s14   ;;  %s5213_s13 = sphi %s5256_s13, %s6406_s13   ;;  %s5209_s12 = sphi %s5254_s12, %s6405_s12  }
   0x5   : > { %s28_s20 = sadd.s32 1, %s5225_s16  ;;  %s118_s21 = sadd.s32 1, %s5217_s14 }
   0x6   : > { %p30_p0 = scmp.ge.s32.totalorder %s28_s20, 2  ;;  %p128_p1 = scmp.ne.s32.totalorder %s5217_s14, %s5213_s13 }
   0x7   : > { %p129_p2 = scmp.eq.s32.totalorder %s3233_s18, 1  ;;  %p134_p3 = scmp.ne.s32.totalorder %s5213_s13, %s5209_s12 }
   0x8   : > { %s6411_s20 = smov (%p30_p0, %s28_s20), 0  ;;  %p135_p5 = scmp.eq.s32.totalorder %s3234_s19, 1 }
   0x9   : > { %p5294_p4 = por %p129_p2, %p128_p1  ;;  %s113_s23 = ssub.s32 %s5225_s16, %s6411_s20 }
   0xa   : > { %p3237_p6 = scmp.ge.s32.totalorder %s5229_s17, 1  ;;  %p116_p7 = scmp.eq.s32.totalorder %s113_s23, 0 }
   0xb   : > { %p5301_p8 = por %p135_p5, %p134_p3  ;;  %p198_p9 = scmp.lt.s32.totalorder %s5229_s17, 3 }
   0xc   : > { %s5307_s25 = scalar_select %p116_p7, %s5217_s14, %s118_s21  }
   0xd   : > { %p199_p10 = pnand %p3237_p6, %p198_p9 }
   0xf   : > { %202 = sbr.rel (%p199_p10) target bundleno = 572 (0x23c), region = 32 }
  0x16   : > { %v3241_v0 = vld [vmem:[%s6334_s2 + $0x80] sm:$0xff]  ;;  %v3242_v1 = vld [vmem:[%s6334_s2 + $0x88] sm:$0xff]  ;;  %p250_p11 = scmp.lt.s32.totalorder %s5221_s15, 1  ;;  %v3243_v5 = vld [vmem:[%s6334_s2 + $0x90] sm:$0xff]  ;;  %s3376_s23 = sshll.u32 %s5221_s15, 12 }
  0x17   : > { %v3289_v2 = vld [vmem:[%s6334_s2 + $0x200] sm:$0xff]  ;;  %v4529_v3 = vpack.c.bf16 %v3242_v1, %v3241_v0  ;;  %v3290_v4 = vld [vmem:[%s6334_s2 + $0x208] sm:$0xff]  ;;  %v3244_v6 = vld [vmem:[%s6334_s2 + $0x98] sm:$0xff]  ;;  %s6278_s4 = scalar_lea.hbm %s6335_s3, %s3376_s23  ;;  %s5231_s6 = smov [#allocation3]  }
  0x18   : > { %v5328_v7 = vpack.c.bf16 %v3290_v4, %v3289_v2  ;;  %v4533_v8 = vpack.c.bf16 %v3244_v6, %v3243_v5  ;;  %v3291_v9 = vld [vmem:[%s6334_s2 + $0x210] sm:$0xff]  ;;  %v3292_v10 = vld [vmem:[%s6334_s2 + $0x218] sm:$0xff]  ;;  %v3245_v11 = vld [vmem:[%s6334_s2 + $0xa0] sm:$0xff]  ;;  %s5340_s27 = scalar_select %p250_p11, %s5221_s15, 1 }
  0x19   : > { %4530 = vmatprep.subr.bf16.mxu1 %v4529_v3  ;;  %v5342_v12 = vpack.c.bf16 %v3292_v10, %v3291_v9  ;;  %v3246_v13 = vld [vmem:[%s6334_s2 + $0xa8] sm:$0xff]  ;;  %v3293_v14 = vld [vmem:[%s6334_s2 + $0x220] sm:$0xff]  ;;  %v3247_v18 = vld [vmem:[%s6334_s2 + $0xb0] sm:$0xff]  ;;  %s5155_s8 = sshll.u32 %s5231_s6, 4  ;;  %s5156_s8 = int_to_ptr.vmem [resolvable:$false] %s5155_s8 }
  0x1a   : > { %v3294_v15 = vld [vmem:[%s6334_s2 + $0x228] sm:$0xff]  ;;  %4658 = vmatprep.subr.bf16.mxu0 %v5328_v7  ;;  %4532 = vmatpush3.bf16.msra.mxu1 %v4529_v3  ;;  %s5089_s7 = smul.u32 432, %s5340_s27  ;;  %v4537_v16 = vpack.c.bf16 %v3246_v13, %v3245_v11  ;;  %v3248_v19 = vld [vmem:[%s6334_s2 + $0xb8] sm:$0xff]  ;;  %v3295_v20 = vld [vmem:[%s6334_s2 + $0x230] sm:$0xff]  ;;  %s241_s27 = sand.u32 1, %s5213_s13  }
  0x1b   : > { %6365 = vst [vmem:[#allocation6_spill] sm:$0xff] %v5342_v12  ;;  %4660 = vmatpush3.bf16.msra.mxu0 %v5328_v7  ;;  %4534 = vmatprep.subr.bf16.mxu1 %v4533_v8  ;;  %v5357_v17 = vpack.c.bf16 %v3294_v15, %v3293_v14  ;;  %v3296_v21 = vld [vmem:[%s6334_s2 + $0x238] sm:$0xff]  ;;  %v4541_v22 = vpack.c.bf16 %v3248_v19, %v3247_v18  ;;  %v3249_v23 = vld [vmem:[%s6334_s2 + $0xc0] sm:$0xff]  ;;  %v3250_v24 = vld [vmem:[%s6334_s2 + $0xc8] sm:$0xff]  ;;  %s6286_s15 = scalar_lea.sflag [#allocation4], %s241_s27 }
  0x1c   : > { %4662 = vmatprep.subr.bf16.mxu0 %v5342_v12  ;;  %s5376_s29 = scalar_lea.vmem %s6332_s0, %s5089_s7  ;;  %v5386_v25 = vpack.c.bf16 %v3296_v21, %v3295_v20  ;;  %v3297_v26 = vld [vmem:[%s6334_s2 + $0x240] sm:$0xff]  ;;  %v3298_v27 = vld [vmem:[%s6334_s2 + $0x248] sm:$0xff]  ;;  %v4545_v33 = vpack.c.bf16 %v3250_v24, %v3249_v23  ;;  %v3251_v34 = vld [vmem:[%s6334_s2 + $0xd0] sm:$0xff]  ;;  %s3375_s9 = sadd.s32 384, %s5089_s7 }
  0x1d   : > { %6366 = vst [vmem:[#allocation7_spill] sm:$0xff] %v5357_v17  ;;  %v5395_v28 = vld [vmem:[%s5376_s29] sm:$0xff]  ;;  %v5398_v29 = vld [vmem:[%s5376_s29 + $0x8] sm:$0xff]  ;;  %v5402_v30 = vld [vmem:[%s5376_s29 + $0x18] sm:$0xff]  ;;  %v5420_v37 = vpack.c.bf16 %v3298_v27, %v3297_v26  ;;  %s5720_s19 = scalar_lea.vmem %s6333_s1, %s3375_s9  ;;  %s3238_s7 = sshll.u32 %s241_s27, 8 }
  0x1e   : > { %4536 = vmatpush3.bf16.msra.mxu1 %v4533_v8  ;;  %6367 = vst [vmem:[#allocation8_spill] sm:$0xff] %v5386_v25  ;;  %329 = vst [vmem:[#allocation2] sm:$0xff] %v5395_v28  ;;  %v5405_v31 = vld [vmem:[%s5376_s29 + $0x20] sm:$0xff]  ;;  %v283_v32 = vld [vmem:[%s5376_s29 + $0x10] sm:$0x3]  ;;  %s6241_s21 = scalar_lea.vmem [#allocation3], %s3238_s7 }
  0x1f   : > { %4664 = vmatpush3.bf16.msra.mxu0 %v5342_v12  ;;  %4538 = vmatprep.subr.bf16.mxu1 %v4537_v16  ;;  %330 = vst [vmem:[#allocation2 + $0x8] sm:$0xff] %v5398_v29  ;;  %332 = vst [vmem:[#allocation2 + $0x18] sm:$0xff] %v5402_v30  ;;  %v3252_v35 = vld [vmem:[%s6334_s2 + $0xd8] sm:$0xff]  ;;  %v286_v36 = vld [vmem:[%s5376_s29 + $0x28] sm:$0x3]  ;;  %s3130_s26 = sshll.u32 %s6241_s21, 4  ;;  %s6280_s26 = int_to_ptr.vmem [resolvable:$true] %s3130_s26 }
  0x20   : > { %4666 = vmatprep.subr.bf16.mxu0 %v5357_v17  ;;  %333 = vst [vmem:[#allocation2 + $0x20] sm:$0xff] %v5405_v31  ;;  %331 = vst [vmem:[#allocation2 + $0x10] sm:$0x3] %v283_v32  ;;  %v5423_v38 = vld [vmem:[%s5376_s29 + $0x30] sm:$0xff]  ;;  %v5426_v39 = vld [vmem:[%s5376_s29 + $0x38] sm:$0xff]  ;;  %v4549_v46 = vpack.c.bf16 %v3252_v35, %v3251_v34  ;;  %s5151_s5 = scalar_lea.vmem %s6280_s26, 4096  ;;  %p5158_p1 = scmp.lt.s32.totalorder %s6280_s26, %s5156_s8 }
  0x21   : > { %6368 = vst [vmem:[#allocation9_spill] sm:$0xff] %v5420_v37  ;;  %334 = vst [vmem:[#allocation2 + $0x28] sm:$0x3] %v286_v36  ;;  %v289_v40 = vld [vmem:[%s5376_s29 + $0x40] sm:$0x3]  ;;  %v3299_v41 = vld [vmem:[%s6334_s2 + $0x250] sm:$0xff]  ;;  %p5152_p12 = scmp.ne.s32.totalorder %s6280_s26, %s5151_s5 }
  0x22   : > { %4540 = vmatpush3.bf16.msra.mxu1 %v4537_v16  ;;  %v3300_v42 = vld [vmem:[%s6334_s2 + $0x258] sm:$0xff]  ;;  %335 = vst [vmem:[#allocation2 + $0x30] sm:$0xff] %v5423_v38  ;;  %336 = vst [vmem:[#allocation2 + $0x38] sm:$0xff] %v5426_v39  ;;  %v5438_v43 = vld [vmem:[%s5376_s29 + $0x48] sm:$0xff]  ;;  %s5157_s9 = scalar_lea.vmem %s5156_s8, 8192 }
  0x23   : > { %4668 = vmatpush3.bf16.msra.mxu0 %v5357_v17  ;;  %4542 = vmatprep.subr.bf16.mxu1 %v4541_v22  ;;  %337 = vst [vmem:[#allocation2 + $0x40] sm:$0x3] %v289_v40  ;;  %v3253_v44 = vld [vmem:[%s6334_s2 + $0xe0] sm:$0xff]  ;;  %v5444_v45 = vld [vmem:[%s5376_s29 + $0x50] sm:$0xff]  ;;  %338 = vst [vmem:[#allocation2 + $0x48] sm:$0xff] %v5438_v43  ;;  %v5457_v50 = vpack.c.bf16 %v3300_v42, %v3299_v41  ;;  %p5153_p13 = pnand %p5152_p12, %p5294_p4  ;;  %p5159_p2 = scmp.lt.s32.totalorder %s5157_s9, %s5151_s5 }
  0x24   : > { %4670 = vmatprep.subr.bf16.mxu0 %v5386_v25  ;;  %v3254_v47 = vld [vmem:[%s6334_s2 + $0xe8] sm:$0xff]  ;;  %v3301_v48 = vld [vmem:[%s6334_s2 + $0x260] sm:$0xff]  ;;  %339 = vst [vmem:[#allocation2 + $0x50] sm:$0xff] %v5444_v45  ;;  %v292_v49 = vld [vmem:[%s5376_s29 + $0x58] sm:$0x3] }
  0x25   : > { %6369 = vst [vmem:[#allocation10_spill] sm:$0xff] %v5457_v50  ;;  %340 = vst [vmem:[#allocation2 + $0x58] sm:$0x3] %v292_v49  ;;  %v5460_v51 = vld [vmem:[%s5376_s29 + $0x60] sm:$0xff]  ;;  %v5463_v52 = vld [vmem:[%s5376_s29 + $0x68] sm:$0xff]  ;;  %v4553_v58 = vpack.c.bf16 %v3254_v47, %v3253_v44  ;;  %p5154_p0 = pneg %p5153_p13  ;;  %p5160_p3 = por %p5159_p2, %p5158_p1 }
  0x26   : > { %4544 = vmatpush3.bf16.msra.mxu1 %v4541_v22  ;;  %v295_v53 = vld [vmem:[%s5376_s29 + $0x70] sm:$0x3]  ;;  %v3302_v54 = vld [vmem:[%s6334_s2 + $0x268] sm:$0xff]  ;;  %341 = vst [vmem:[#allocation2 + $0x60] sm:$0xff] %v5460_v51  ;;  %342 = vst [vmem:[#allocation2 + $0x68] sm:$0xff] %v5463_v52 }
  0x27   : > { %4672 = vmatpush3.bf16.msra.mxu0 %v5386_v25  ;;  %4546 = vmatprep.subr.bf16.mxu1 %v4545_v33  ;;  %v438_v55 = vld [vmem:[#allocation2 + $0x1] sm:$0xff]  ;;  %v5469_v56 = vld [vmem:[#allocation2 + $0x19] sm:$0xff]  ;;  %343 = vst [vmem:[#allocation2 + $0x70] sm:$0x3] %v295_v53  ;;  %v5482_v60 = vpack.c.bf16 %v3302_v54, %v3301_v48  ;;  %v3255_v61 = vld [vmem:[%s6334_s2 + $0xf0] sm:$0xff]  ;;  %p5161_p5 = pnand %p5160_p3, %p5154_p0 }
  0x28   : > { %4674 = vmatprep.subr.bf16.mxu0 %v5420_v37  ;;  %3841 = vmatprep.mubr.f32.mxu1 %v438_v55  ;;  %v5474_v57 = vld [vmem:[%s5376_s29 + $0x78] sm:$0xff]  ;;  %v5478_v59 = vld [vmem:[%s5376_s29 + $0x80] sm:$0xff]  ;;  %v3303_v63 = vld [vmem:[%s6334_s2 + $0x270] sm:$0xff] }
  0x29   : > { %344 = vst [vmem:[#allocation2 + $0x78] sm:$0xff] %v5474_v57  ;;  %6370 = vst [vmem:[#allocation11_spill] sm:$0xff] %v5482_v60  ;;  %v3256_v62 = vld [vmem:[%s6334_s2 + $0xf8] sm:$0xff]  ;;  %4161 = vmatprep.mubr.f32.mxu0 %v5469_v56  ;;  %v298_v1 = vld [vmem:[%s5376_s29 + $0x88] sm:$0x3] }
  0x2a   : > { %4548 = vmatpush3.bf16.msra.mxu1 %v4545_v33  ;;  %345 = vst [vmem:[#allocation2 + $0x80] sm:$0xff] %v5478_v59  ;;  %v3304_v0 = vld [vmem:[%s6334_s2 + $0x278] sm:$0xff]  ;;  %346 = vst [vmem:[#allocation2 + $0x88] sm:$0x3] %v298_v1  ;;  %v5500_v2 = vld [vmem:[%s5376_s29 + $0x90] sm:$0xff]  ;;  %v4557_v4 = vpack.c.bf16 %v3256_v62, %v3255_v61 }
  0x2b   : > { %4676 = vmatpush3.bf16.msra.mxu0 %v5420_v37  ;;  %4550 = vmatprep.subr.bf16.mxu1 %v4549_v46  ;;  %v5503_v3 = vld [vmem:[%s5376_s29 + $0x98] sm:$0xff]  ;;  %347 = vst [vmem:[#allocation2 + $0x90] sm:$0xff] %v5500_v2  ;;  %v301_v5 = vld [vmem:[%s5376_s29 + $0xa0] sm:$0x3]  ;;  %v5510_v6 = vpack.c.bf16 %v3304_v0, %v3303_v63  ;;  %v423_v9 = vld [vmem:[%s6334_s2 + $0x8] sm:$0xff] }
  0x2c   : > { %4678 = vmatprep.subr.bf16.mxu0 %v5457_v50  ;;  %348 = vst [vmem:[#allocation2 + $0x98] sm:$0xff] %v5503_v3  ;;  %v422_v8 = vld [vmem:[%s6334_s2] sm:$0xff]  ;;  %349 = vst [vmem:[#allocation2 + $0xa0] sm:$0x3] %v301_v5  ;;  %v3306_v11 = vld [vmem:[%s6334_s2 + $0x288] sm:$0xff] }
  0x2d   : > { %6371 = vst [vmem:[#allocation12_spill] sm:$0xff] %v5510_v6  ;;  %v3305_v10 = vld [vmem:[%s6334_s2 + $0x280] sm:$0xff]  ;;  %v5525_v13 = vld [vmem:[%s5376_s29 + $0xa8] sm:$0xff]  ;;  %v5528_v14 = vld [vmem:[%s5376_s29 + $0xb0] sm:$0xff]  ;;  %v4561_v16 = vpack.c.bf16 %v423_v9, %v422_v8 }
  0x2e   : > { %4552 = vmatpush3.bf16.msra.mxu1 %v4549_v46  ;;  %350 = vst [vmem:[#allocation2 + $0xa8] sm:$0xff] %v5525_v13  ;;  %351 = vst [vmem:[#allocation2 + $0xb0] sm:$0xff] %v5528_v14  ;;  %v304_v15 = vld [vmem:[%s5376_s29 + $0xb8] sm:$0x3]  ;;  %v5535_v18 = vld [vmem:[%s5376_s29 + $0xc0] sm:$0xff]  ;;  %v4689_v19 = vpack.c.bf16 %v3306_v11, %v3305_v10 }
  0x2f   : > { %4680 = vmatpush3.bf16.msra.mxu0 %v5457_v50  ;;  %4554 = vmatprep.subr.bf16.mxu1 %v4553_v58  ;;  %352 = vst [vmem:[#allocation2 + $0xb8] sm:$0x3] %v304_v15  ;;  %v5539_v20 = vld [vmem:[%s5376_s29 + $0xc8] sm:$0xff]  ;;  %353 = vst [vmem:[#allocation2 + $0xc0] sm:$0xff] %v5535_v18  ;;  %v307_v21 = vld [vmem:[%s5376_s29 + $0xd0] sm:$0x3] }
  0x30   : > { %4682 = vmatprep.subr.bf16.mxu0 %v5482_v60  ;;  %v3307_v22 = vld [vmem:[%s6334_s2 + $0x290] sm:$0xff]  ;;  %v3308_v23 = vld [vmem:[%s6334_s2 + $0x298] sm:$0xff]  ;;  %354 = vst [vmem:[#allocation2 + $0xc8] sm:$0xff] %v5539_v20  ;;  %355 = vst [vmem:[#allocation2 + $0xd0] sm:$0x3] %v307_v21 }
  0x31   : > { %v439_v24 = vld [vmem:[#allocation2 + $0x9] sm:$0xff]  ;;  %v425_v27 = vld [vmem:[%s6334_s2 + $0x18] sm:$0xff]  ;;  %v1551_v32 = vld [vmem:[#allocation2 + $0x21] sm:$0xff]  ;;  %v4693_v33 = vpack.c.bf16 %v3308_v23, %v3307_v22 }
  0x32   : > { %4556 = vmatpush3.bf16.msra.mxu1 %v4553_v58  ;;  %v424_v26 = vld [vmem:[%s6334_s2 + $0x10] sm:$0xff]  ;;  %v3309_v34 = vld [vmem:[%s6334_s2 + $0x2a0] sm:$0xff]  ;;  %v5561_v35 = vld [vmem:[%s5376_s29 + $0xd8] sm:$0xff] }
  0x33   : > { %4684 = vmatpush3.bf16.msra.mxu0 %v5482_v60  ;;  %4558 = vmatprep.subr.bf16.mxu1 %v4557_v4  ;;  %v5564_v36 = vld [vmem:[%s5376_s29 + $0xe0] sm:$0xff]  ;;  %v1552_v40 = vld [vmem:[#allocation2 + $0x31] sm:$0xff]  ;;  %v4565_v41 = vpack.c.bf16 %v425_v27, %v424_v26  ;;  %v3310_v42 = vld [vmem:[%s6334_s2 + $0x2a8] sm:$0xff]  ;;  %356 = vst [vmem:[#allocation2 + $0xd8] sm:$0xff] %v5561_v35 }
  0x34   : > { %4686 = vmatprep.subr.bf16.mxu0 %v5510_v6  ;;  %357 = vst [vmem:[#allocation2 + $0xe0] sm:$0xff] %v5564_v36  ;;  %v310_v44 = vld [vmem:[%s5376_s29 + $0xe8] sm:$0x3]  ;;  %v426_v46 = vld [vmem:[%s6334_s2 + $0x20] sm:$0xff]  ;;  %v5579_v48 = vld [vmem:[%s5376_s29 + $0xf0] sm:$0xff]  ;;  %v4697_v58 = vpack.c.bf16 %v3310_v42, %v3309_v34 }
  0x35   : > { %v427_v47 = vld [vmem:[%s6334_s2 + $0x28] sm:$0xff]  ;;  %358 = vst [vmem:[#allocation2 + $0xe8] sm:$0x3] %v310_v44  ;;  %v1553_v49 = vld [vmem:[#allocation2 + $0x39] sm:$0xff]  ;;  %359 = vst [vmem:[#allocation2 + $0xf0] sm:$0xff] %v5579_v48 }
  0x36   : > { %4560 = vmatpush3.bf16.msra.mxu1 %v4557_v4  ;;  %v5583_v53 = vld [vmem:[%s5376_s29 + $0xf8] sm:$0xff]  ;;  %v313_v54 = vld [vmem:[%s5376_s29 + $0x100] sm:$0x3]  ;;  %v1554_v55 = vld [vmem:[#allocation2 + $0x49] sm:$0xff]  ;;  %v4569_v62 = vpack.c.bf16 %v427_v47, %v426_v46 }
  0x37   : > { %4688 = vmatpush3.bf16.msra.mxu0 %v5510_v6  ;;  %4562 = vmatprep.subr.bf16.mxu1 %v4561_v16  ;;  %360 = vst [vmem:[#allocation2 + $0xf8] sm:$0xff] %v5583_v53  ;;  %361 = vst [vmem:[#allocation2 + $0x100] sm:$0x3] %v313_v54  ;;  %v3312_v61 = vld [vmem:[%s6334_s2 + $0x2b8] sm:$0xff]  ;;  %v428_v63 = vld [vmem:[%s6334_s2 + $0x30] sm:$0xff] }
  0x38   : > { %4690 = vmatprep.subr.bf16.mxu0 %v4689_v19  ;;  %v429_v0 = vld [vmem:[%s6334_s2 + $0x38] sm:$0xff]  ;;  %v5601_v1 = vld [vmem:[%s5376_s29 + $0x108] sm:$0xff]  ;;  %v5604_v4 = vld [vmem:[%s5376_s29 + $0x110] sm:$0xff] }
  0x39   : > { %3842 = vmatmul.mubr.f32.vlgmr.msra.gmra.mrb[0].mxu1 %v439_v24  ;;  %v1555_v5 = vld [vmem:[#allocation2 + $0x51] sm:$0xff]  ;;  %362 = vst [vmem:[#allocation2 + $0x108] sm:$0xff] %v5601_v1  ;;  %363 = vst [vmem:[#allocation2 + $0x110] sm:$0xff] %v5604_v4  ;;  %v1556_v9 = vld [vmem:[#allocation2 + $0x61] sm:$0xff]  ;;  %v4573_v21 = vpack.c.bf16 %v429_v0, %v428_v63 }
  0x3a   : > { %4162 = vmatmul.mubr.f32.vlgmr.msra.gmra.mrb[0].mxu0 %v1551_v32  ;;  %4564 = vmatpush3.bf16.msra.mxu1 %v4561_v16  ;;  %v316_v8 = vld [vmem:[%s5376_s29 + $0x118] sm:$0x3]  ;;  %v5610_v11 = vld [vmem:[%s5376_s29 + $0x120] sm:$0xff]  ;;  %v5613_v15 = vld [vmem:[%s5376_s29 + $0x128] sm:$0xff] }
  0x3b   : > { %4692 = vmatpush3.bf16.msra.mxu0 %v4689_v19  ;;  %3844 = vmatprep.mubr.f32.mxu1 %v5469_v56  ;;  %v3311_v56 = vld [vmem:[%s6334_s2 + $0x2b0] sm:$0xff]  ;;  %364 = vst [vmem:[#allocation2 + $0x118] sm:$0x3] %v316_v8  ;;  %v3313_v16 = vld [vmem:[%s6334_s2 + $0x2c0] sm:$0xff]  ;;  %v3314_v19 = vld [vmem:[%s6334_s2 + $0x2c8] sm:$0xff] }
  0x3c   : > { %4164 = vmatprep.mubr.f32.mxu0 %v1552_v40  ;;  %4694 = vmatprep.subr.bf16.mxu0 %v4693_v33  ;;  %v4701_v10 = vpack.c.bf16 %v3312_v61, %v3311_v56  ;;  %365 = vst [vmem:[#allocation2 + $0x120] sm:$0xff] %v5610_v11  ;;  %366 = vst [vmem:[#allocation2 + $0x128] sm:$0xff] %v5613_v15  ;;  %v319_v22 = vld [vmem:[%s5376_s29 + $0x130] sm:$0x3]  ;;  %v430_v23 = vld [vmem:[%s6334_s2 + $0x40] sm:$0xff] }
  0x3d   : > { %3845 = vmatmul.mubr.f32.gmra.mrb[2].mxu1 %v1551_v32  ;;  %4566 = vmatprep.subr.bf16.mxu1 %v4565_v41  ;;  %v431_v24 = vld [vmem:[%s6334_s2 + $0x48] sm:$0xff]  ;;  %367 = vst [vmem:[#allocation2 + $0x130] sm:$0x3] %v319_v22  ;;  %v3315_v27 = vld [vmem:[%s6334_s2 + $0x2d0] sm:$0xff]  ;;  %v1558_v32 = vld [vmem:[#allocation2 + $0x79] sm:$0xff] }
  0x3e   : > { %4165 = vmatmul.mubr.f32.gmra.mrb[2].mxu0 %v1553_v49  ;;  %3847 = vmatprep.mubr.f32.mxu1 %v1552_v40  ;;  %v1557_v26 = vld [vmem:[#allocation2 + $0x69] sm:$0xff]  ;;  %v5634_v34 = vld [vmem:[%s5376_s29 + $0x138] sm:$0xff]  ;;  %v5637_v40 = vld [vmem:[%s5376_s29 + $0x140] sm:$0xff]  ;;  %v4577_v42 = vpack.c.bf16 %v431_v24, %v430_v23 }
  0x3f   : > { %4696 = vmatpush3.bf16.msra.mxu0 %v4693_v33  ;;  %4167 = vmatprep.mubr.f32.mxu0 %v1554_v55  ;;  %v4705_v33 = vpack.c.bf16 %v3314_v19, %v3313_v16  ;;  %v432_v44 = vld [vmem:[%s6334_s2 + $0x50] sm:$0xff]  ;;  %368 = vst [vmem:[#allocation2 + $0x138] sm:$0xff] %v5634_v34  ;;  %369 = vst [vmem:[#allocation2 + $0x140] sm:$0xff] %v5637_v40  ;;  %v322_v46 = vld [vmem:[%s5376_s29 + $0x148] sm:$0x3] }
  0x40   : > { %4698 = vmatprep.subr.bf16.mxu0 %v4697_v58  ;;  %4568 = vmatpush3.bf16.msra.mxu1 %v4565_v41  ;;  %v3316_v41 = vld [vmem:[%s6334_s2 + $0x2d8] sm:$0xff]  ;;  %370 = vst [vmem:[#allocation2 + $0x148] sm:$0x3] %v322_v46  ;;  %v3318_v63 = vld [vmem:[%s6334_s2 + $0x2e8] sm:$0xff]  ;;  %v3319_v23 = vld [vmem:[%s6334_s2 + $0x2f0] sm:$0xff] }
  0x41   : > { %3848 = vmatmul.mubr.f32.gmra.mrb[4].mxu1 %v1553_v49  ;;  %4570 = vmatprep.subr.bf16.mxu1 %v4569_v62  ;;  %v433_v47 = vld [vmem:[%s6334_s2 + $0x58] sm:$0xff]  ;;  %v5652_v49 = vld [vmem:[%s5376_s29 + $0x150] sm:$0xff]  ;;  %v4709_v61 = vpack.c.bf16 %v3316_v41, %v3315_v27  ;;  %v435_v8 = vld [vmem:[%s6334_s2 + $0x68] sm:$0xff] }
  0x42   : > { %4168 = vmatmul.mubr.f32.gmra.mrb[4].mxu0 %v1555_v5  ;;  %3850 = vmatprep.mubr.f32.mxu1 %v1554_v55  ;;  %v5655_v54 = vld [vmem:[%s5376_s29 + $0x158] sm:$0xff]  ;;  %v1559_v55 = vld [vmem:[#allocation2 + $0x81] sm:$0xff]  ;;  %371 = vst [vmem:[#allocation2 + $0x150] sm:$0xff] %v5652_v49  ;;  %v4581_v0 = vpack.c.bf16 %v433_v47, %v432_v44  ;;  %v436_v27 = vld [vmem:[%s6334_s2 + $0x70] sm:$0xff] }
  0x43   : > { %4700 = vmatpush3.bf16.msra.mxu0 %v4697_v58  ;;  %4170 = vmatprep.mubr.f32.mxu0 %v1556_v9  ;;  %372 = vst [vmem:[#allocation2 + $0x158] sm:$0xff] %v5655_v54  ;;  %v325_v58 = vld [vmem:[%s5376_s29 + $0x160] sm:$0x3]  ;;  %v1560_v56 = vld [vmem:[#allocation2 + $0x91] sm:$0xff]  ;;  %v3322_v46 = vld [vmem:[%s6334_s2 + $0x308] sm:$0xff] }
  0x44   : > { %4702 = vmatprep.subr.bf16.mxu0 %v4701_v10  ;;  %4572 = vmatpush3.bf16.msra.mxu1 %v4569_v62  ;;  %373 = vst [vmem:[#allocation2 + $0x160] sm:$0x3] %v325_v58  ;;  %v3317_v62 = vld [vmem:[%s6334_s2 + $0x2e0] sm:$0xff]  ;;  %v328_v19 = vld [vmem:[%s5376_s29 + $0x178] sm:$0x3]  ;;  %v3258_v58 = vld [vmem:[%s6334_s2 + $0x108] sm:$0xff] }
  0x45   : > { %3851 = vmatmul.mubr.f32.gmra.mrb[6].mxu1 %v1555_v5  ;;  %4574 = vmatprep.subr.bf16.mxu1 %v4573_v21  ;;  %v434_v5 = vld [vmem:[%s6334_s2 + $0x60] sm:$0xff]  ;;  %v4713_v22 = vpack.c.bf16 %v3318_v63, %v3317_v62  ;;  %376 = vst [vmem:[#allocation2 + $0x178] sm:$0x3] %v328_v19  ;;  %v3320_v24 = vld [vmem:[%s6334_s2 + $0x2f8] sm:$0xff]  ;;  %v3323_v63 = vld [vmem:[%s6334_s2 + $0x310] sm:$0xff] }
  0x46   : > { %4171 = vmatmul.mubr.f32.gmra.mrb[6].mxu0 %v1557_v26  ;;  %3853 = vmatprep.mubr.f32.mxu1 %v1556_v9  ;;  %v5673_v9 = vld [vmem:[%s5376_s29 + $0x168] sm:$0xff]  ;;  %v1561_v16 = vld [vmem:[#allocation2 + $0x99] sm:$0xff] }
  0x47   : > { %4704 = vmatpush3.bf16.msra.mxu0 %v4701_v10  ;;  %4173 = vmatprep.mubr.f32.mxu0 %v1558_v32  ;;  %v5676_v10 = vld [vmem:[%s5376_s29 + $0x170] sm:$0xff]  ;;  %374 = vst [vmem:[#allocation2 + $0x168] sm:$0xff] %v5673_v9  ;;  %v1564_v41 = vld [vmem:[#allocation2 + $0xc1] sm:$0xff] }
  0x48   : > { %4706 = vmatprep.subr.bf16.mxu0 %v4705_v33  ;;  %4576 = vmatpush3.bf16.msra.mxu1 %v4573_v21  ;;  %375 = vst [vmem:[#allocation2 + $0x170] sm:$0xff] %v5676_v10  ;;  %v1562_v21 = vld [vmem:[#allocation2 + $0xa9] sm:$0xff]  ;;  %v3321_v44 = vld [vmem:[%s6334_s2 + $0x300] sm:$0xff]  ;;  %v5725_v19 = vld [vmem:[#allocation2 + $0x32] sm:$0xff] }
  0x49   : > { %3854 = vmatmul.mubr.f32.gmra.mrb[8].mxu1 %v1557_v26  ;;  %4578 = vmatprep.subr.bf16.mxu1 %v4577_v42  ;;  %v4585_v26 = vpack.c.bf16 %v435_v8, %v434_v5  ;;  %v4721_v62 = vpack.c.bf16 %v3322_v46, %v3321_v44  ;;  %v5723_v8 = vld [vmem:[#allocation2 + $0x22] sm:$0xff]  ;;  %v3327_v46 = vld [vmem:[%s6334_s2 + $0x330] sm:$0xff] }
  0x4a   : > { %4174 = vmatmul.mubr.f32.gmra.mrb[8].mxu0 %v1559_v55  ;;  %3856 = vmatprep.mubr.f32.mxu1 %v1558_v32  ;;  %v437_v32 = vld [vmem:[%s6334_s2 + $0x78] sm:$0xff]  ;;  %v3334_v6 = vld [vmem:[%s6334_s2 + $0x368] sm:$0xff]  ;;  %v3337_v25 = vld [vmem:[%s6334_s2 + $0x380] sm:$0xff] }
  0x4b   : > { %4708 = vmatpush3.bf16.msra.mxu0 %v4705_v33  ;;  %4176 = vmatprep.mubr.f32.mxu0 %v1560_v56  ;;  %v1563_v33 = vld [vmem:[#allocation2 + $0xb1] sm:$0xff]  ;;  %v4589_v47 = vpack.c.bf16 %v437_v32, %v436_v27  ;;  %v3326_v27 = vld [vmem:[%s6334_s2 + $0x328] sm:$0xff]  ;;  %v5815_v37 = vld [vmem:[#allocation2 + $0x159] sm:$0xff] }
  0x4c   : > { %4710 = vmatprep.subr.bf16.mxu0 %v4709_v61  ;;  %4580 = vmatpush3.bf16.msra.mxu1 %v4577_v42  ;;  %v4717_v42 = vpack.c.bf16 %v3320_v24, %v3319_v23  ;;  %v5731_v23 = vld [vmem:[%s5720_s19 + $0x8] sm:$0xff]  ;;  %v379_v24 = vld [vmem:[%s5720_s19 + $0x10] sm:$0x3]  ;;  %6373 = vst [vmem:[#allocation14_spill] sm:$0xff] %v5815_v37 }
  0x4d   : > { %3857 = vmatmul.mubr.f32.gmra.mrb[10].mxu1 %v1559_v55  ;;  %4582 = vmatprep.subr.bf16.mxu1 %v4581_v0  ;;  %v3257_v55 = vld [vmem:[%s6334_s2 + $0x100] sm:$0xff]  ;;  %385 = vst [vmem:[#allocation2 + $0x188] sm:$0xff] %v5731_v23  ;;  %386 = vst [vmem:[#allocation2 + $0x190] sm:$0x3] %v379_v24  ;;  %v5769_v24 = vld [vmem:[#allocation2 + $0x6a] sm:$0xff] }
  0x4e   : > { %4177 = vmatmul.mubr.f32.gmra.mrb[10].mxu0 %v1561_v16  ;;  %3859 = vmatprep.mubr.f32.mxu1 %v1560_v56  ;;  %v1565_v56 = vld [vmem:[#allocation2 + $0xc9] sm:$0xff]  ;;  %v5715_v5 = vpack.c.bf16 %v3258_v58, %v3257_v55  ;;  %v457_v32 = vld [vmem:[#allocation2 + $0xe1] sm:$0xff]  ;;  %v459_v55 = vld [vmem:[#allocation2 + $0xf9] sm:$0xff] }
  0x4f   : > { %4712 = vmatpush3.bf16.msra.mxu0 %v4709_v61  ;;  %4179 = vmatprep.mubr.f32.mxu0 %v1562_v21  ;;  %v5707_v61 = vld [vmem:[#allocation2 + $0x1a] sm:$0xff]  ;;  %v5757_v58 = vld [vmem:[#allocation2 + $0x52] sm:$0xff]  ;;  %v3266_v12 = vld [vmem:[%s6334_s2 + $0x148] sm:$0xff] }
  0x50   : > { %4714 = vmatprep.subr.bf16.mxu0 %v4713_v22  ;;  %4584 = vmatpush3.bf16.msra.mxu1 %v4581_v0  ;;  %v3324_v0 = vld [vmem:[%s6334_s2 + $0x318] sm:$0xff]  ;;  %v465_v60 = vld [vmem:[#allocation2 + $0x141] sm:$0xff] }
  0x51   : > { %3860 = vmatmul.mubr.f32.gmra.mrb[12].mxu1 %v1561_v16  ;;  %4586 = vmatprep.subr.bf16.mxu1 %v4585_v26  ;;  %v456_v16 = vld [vmem:[#allocation2 + $0xd9] sm:$0xff]  ;;  %v5803_v50 = vld [vmem:[#allocation2 + $0x151] sm:$0xff] }
  0x52   : > { %4180 = vmatmul.mubr.f32.gmra.mrb[12].mxu0 %v1563_v33  ;;  %3862 = vmatprep.mubr.f32.mxu1 %v1562_v21  ;;  %v4725_v21 = vpack.c.bf16 %v3324_v0, %v3323_v63  ;;  %v3329_v0 = vld [vmem:[%s6334_s2 + $0x340] sm:$0xff]  ;;  %6372 = vst [vmem:[#allocation13_spill] sm:$0xff] %v5803_v50  ;;  %v5833_v17 = vld [vmem:[#allocation2 + $0x171] sm:$0xff] }
  0x53   : > { %4716 = vmatpush3.bf16.msra.mxu0 %v4713_v22  ;;  %4182 = vmatprep.mubr.f32.mxu0 %v1564_v41  ;;  %v5728_v22 = vld [vmem:[%s5720_s19] sm:$0xff]  ;;  %6375 = vst [vmem:[#allocation16_spill] sm:$0xff] %v5833_v17 }
  0x54   : > { %4718 = vmatprep.subr.bf16.mxu0 %v4717_v42  ;;  %4588 = vmatpush3.bf16.msra.mxu1 %v4585_v26  ;;  %v3325_v26 = vld [vmem:[%s6334_s2 + $0x320] sm:$0xff]  ;;  %384 = vst [vmem:[#allocation2 + $0x180] sm:$0xff] %v5728_v22 }
  0x55   : > { %3863 = vmatmul.mubr.f32.gmra.mrb[14].mxu1 %v1563_v33  ;;  %4590 = vmatprep.subr.bf16.mxu1 %v4589_v47  ;;  %v5745_v33 = vld [vmem:[#allocation2 + $0x3a] sm:$0xff]  ;;  %v4729_v44 = vpack.c.bf16 %v3326_v27, %v3325_v26 }
  0x56   : > { %4183 = vmatmul.mubr.f32.gmra.mrb[14].mxu0 %v1565_v56  ;;  %3865 = vmatprep.mubr.f32.mxu1 %v1564_v41  ;;  %v458_v41 = vld [vmem:[#allocation2 + $0xf1] sm:$0xff]  ;;  %v462_v26 = vld [vmem:[#allocation2 + $0x121] sm:$0xff] }
  0x57   : > { %4720 = vmatpush3.bf16.msra.mxu0 %v4717_v42  ;;  %4241 = vmatprep.mubr.f32.mxu0 %v5707_v61  ;;  %v5747_v42 = vld [vmem:[#allocation2 + $0x4a] sm:$0xff]  ;;  %v5771_v27 = vld [vmem:[#allocation2 + $0x7a] sm:$0xff] }
  0x58   : > { %4722 = vmatprep.subr.bf16.mxu0 %v4721_v62  ;;  %4592 = vmatpush3.bf16.msra.mxu1 %v4589_v47  ;;  %v3328_v47 = vld [vmem:[%s6334_s2 + $0x338] sm:$0xff] }
  0x59   : > { %3866 = vmatmul.mubr.f32.gmra.mrb[16].mxu1 %v1565_v56  ;;  %4594 = vmatprep.subr.bf16.mxu1 %v5715_v5  ;;  %v460_v56 = vld [vmem:[#allocation2 + $0x109] sm:$0xff]  ;;  %v4733_v63 = vpack.c.bf16 %v3328_v47, %v3327_v46  ;;  %v3332_v46 = vld [vmem:[%s6334_s2 + $0x358] sm:$0xff] }
  0x5a   : > { %4242 = vmatmul.mubr.f32.vlgmr.msra.gmra.mrb[0].mxu0 %v5723_v8  ;;  %3868 = vmatprep.mubr.f32.mxu1 %v456_v16  ;;  %v3330_v16 = vld [vmem:[%s6334_s2 + $0x348] sm:$0xff]  ;;  %v5780_v47 = vld [vmem:[%s5720_s19 + $0x18] sm:$0xff] }
  0x5b   : > { %4724 = vmatpush3.bf16.msra.mxu0 %v4721_v62  ;;  %4244 = vmatprep.mubr.f32.mxu0 %v5725_v19  ;;  %v5759_v62 = vld [vmem:[#allocation2 + $0x62] sm:$0xff]  ;;  %387 = vst [vmem:[#allocation2 + $0x198] sm:$0xff] %v5780_v47 }
  0x5c   : > { %4726 = vmatprep.subr.bf16.mxu0 %v4725_v21 }
  0x5d   : > { %3869 = vmatmul.mubr.f32.gmra.mrb[18].mxu1 %v457_v32  ;;  %v4737_v32 = vpack.c.bf16 %v3330_v16, %v3329_v0  ;;  %v464_v0 = vld [vmem:[#allocation2 + $0x139] sm:$0xff] }
  0x5e   : > { %4245 = vmatmul.mubr.f32.gmra.mrb[2].mxu0 %v5745_v33  ;;  %3871 = vmatprep.mubr.f32.mxu1 %v458_v41  ;;  %v3331_v41 = vld [vmem:[%s6334_s2 + $0x350] sm:$0xff] }
  0x5f   : > { %4247 = vmatprep.mubr.f32.mxu0 %v5747_v42  ;;  %4728 = vmatpush3.bf16.msra.mxu0 %v4725_v21  ;;  %v461_v21 = vld [vmem:[#allocation2 + $0x111] sm:$0xff] }
  0x60   : > { %4730 = vmatprep.subr.bf16.mxu0 %v4729_v44  ;;  %v5791_v16 = vld [vmem:[#allocation2 + $0x92] sm:$0xff] }
  0x61   : > { %3872 = vmatmul.mubr.f32.gmra.mrb[20].mxu1 %v459_v55  ;;  %v5783_v55 = vld [vmem:[%s5720_s19 + $0x20] sm:$0xff] }
  0x62   : > { %4248 = vmatmul.mubr.f32.gmra.mrb[4].mxu0 %v5757_v58  ;;  %3874 = vmatprep.mubr.f32.mxu1 %v460_v56  ;;  %388 = vst [vmem:[#allocation2 + $0x1a0] sm:$0xff] %v5783_v55  ;;  %v5789_v56 = vld [vmem:[#allocation2 + $0x82] sm:$0xff] }
  0x63   : > { %4250 = vmatprep.mubr.f32.mxu0 %v5759_v62  ;;  %4732 = vmatpush3.bf16.msra.mxu0 %v4729_v44  ;;  %v463_v44 = vld [vmem:[#allocation2 + $0x129] sm:$0xff] }
  0x64   : > { %4734 = vmatprep.subr.bf16.mxu0 %v4733_v63 }
  0x65   : > { %3875 = vmatmul.mubr.f32.gmra.mrb[22].mxu1 %v461_v21  ;;  %v4741_v21 = vpack.c.bf16 %v3332_v46, %v3331_v41  ;;  %v5805_v41 = vld [vmem:[#allocation2 + $0xaa] sm:$0xff] }
  0x66   : > { %4251 = vmatmul.mubr.f32.gmra.mrb[6].mxu0 %v5769_v24  ;;  %3877 = vmatprep.mubr.f32.mxu1 %v462_v26  ;;  %v3333_v26 = vld [vmem:[%s6334_s2 + $0x360] sm:$0xff] }
  0x67   : > { %4253 = vmatprep.mubr.f32.mxu0 %v5771_v27  ;;  %4736 = vmatpush3.bf16.msra.mxu0 %v4733_v63  ;;  %v5801_v63 = vld [vmem:[#allocation2 + $0x9a] sm:$0xff]  ;;  %v4745_v46 = vpack.c.bf16 %v3334_v6, %v3333_v26  ;;  %v5820_v6 = vld [vmem:[#allocation2 + $0x169] sm:$0xff] }
  0x68   : > { %4738 = vmatprep.subr.bf16.mxu0 %v4737_v32  ;;  %6374 = vst [vmem:[#allocation15_spill] sm:$0xff] %v5820_v6 }
  0x69   : > { %3878 = vmatmul.mubr.f32.gmra.mrb[24].mxu1 %v463_v44  ;;  %v3335_v44 = vld [vmem:[%s6334_s2 + $0x370] sm:$0xff] }
  0x6a   : > { %4254 = vmatmul.mubr.f32.gmra.mrb[8].mxu0 %v5789_v56  ;;  %3880 = vmatprep.mubr.f32.mxu1 %v464_v0  ;;  %v3336_v0 = vld [vmem:[%s6334_s2 + $0x378] sm:$0xff] }
  0x6b   : > { %4256 = vmatprep.mubr.f32.mxu0 %v5791_v16  ;;  %4740 = vmatpush3.bf16.msra.mxu0 %v4737_v32  ;;  %v5818_v32 = vld [vmem:[#allocation2 + $0xb2] sm:$0xff]  ;;  %v4749_v26 = vpack.c.bf16 %v3336_v0, %v3335_v44  ;;  %v5838_v44 = vld [vmem:[#allocation2 + $0xda] sm:$0xff] }
  0x6c   : > { %4742 = vmatprep.subr.bf16.mxu0 %v4741_v21 }
  0x6d   : > { %3881 = vmatmul.mubr.f32.gmra.mrb[26].mxu1 %v465_v60  ;;  %v5822_v60 = vld [vmem:[#allocation2 + $0xc2] sm:$0xff] }
  0x6e   : > { %4257 = vmatmul.mubr.f32.gmra.mrb[10].mxu0 %v5801_v63  ;;  %3883 = vmatprep.mubr.f32.mxu1 %v5803_v50  ;;  %v3338_v50 = vld [vmem:[%s6334_s2 + $0x388] sm:$0xff] }
  0x6f   : > { %4259 = vmatprep.mubr.f32.mxu0 %v5805_v41  ;;  %4744 = vmatpush3.bf16.msra.mxu0 %v4741_v21  ;;  %v5836_v21 = vld [vmem:[#allocation2 + $0xca] sm:$0xff]  ;;  %v5840_v0 = vpack.c.bf16 %v3338_v50, %v3337_v25  ;;  %v5854_v25 = vld [vmem:[#allocation2 + $0xf2] sm:$0xff] }
  0x70   : > { %4746 = vmatprep.subr.bf16.mxu0 %v4745_v46 }
  0x71   : > { %3884 = vmatmul.mubr.f32.gmra.mrb[28].mxu1 %v5815_v37  ;;  %v3259_v37 = vld [vmem:[%s6334_s2 + $0x110] sm:$0xff] }
  0x72   : > { %4260 = vmatmul.mubr.f32.gmra.mrb[12].mxu0 %v5818_v32  ;;  %3886 = vmatprep.mubr.f32.mxu1 %v5820_v6  ;;  %v3260_v6 = vld [vmem:[%s6334_s2 + $0x118] sm:$0xff] }
  0x73   : > { %4262 = vmatprep.mubr.f32.mxu0 %v5822_v60  ;;  %4748 = vmatpush3.bf16.msra.mxu0 %v4745_v46  ;;  %v5852_v46 = vld [vmem:[#allocation2 + $0xe2] sm:$0xff]  ;;  %v4597_v50 = vpack.c.bf16 %v3260_v6, %v3259_v37  ;;  %v5868_v37 = vld [vmem:[#allocation2 + $0xfa] sm:$0xff]  ;;  %v5870_v6 = vld [vmem:[#allocation2 + $0x10a] sm:$0xff] }
  0x74   : > { %4750 = vmatprep.subr.bf16.mxu0 %v4749_v26  ;;  %6376 = vst [vmem:[#allocation17_spill] sm:$0xff] %v5868_v37  ;;  %6377 = vst [vmem:[#allocation18_spill] sm:$0xff] %v5870_v6 }
  0x75   : > { %3887 = vmatmul.mubr.f32.gmra.mrb[30].mxu1 %v5833_v17  ;;  %v3261_v17 = vld [vmem:[%s6334_s2 + $0x120] sm:$0xff] }
  0x76   : > { %4263 = vmatmul.mubr.f32.gmra.mrb[14].mxu0 %v5836_v21  ;;  %3921 = vmatprep.mubr.f32.mxu1 %v5395_v28  ;;  %v3262_v28 = vld [vmem:[%s6334_s2 + $0x128] sm:$0xff] }
  0x77   : > { %4265 = vmatprep.mubr.f32.mxu0 %v5838_v44  ;;  %4752 = vmatpush3.bf16.msra.mxu0 %v4749_v26  ;;  %v3263_v26 = vld [vmem:[%s6334_s2 + $0x130] sm:$0xff] }
  0x78   : > { %4754 = vmatprep.subr.bf16.mxu0 %v5840_v0 }
  0x79   : > { %3922 = vmatmul.mubr.f32.vlgmr.msra.gmra.mrb[0].mxu1 %v5398_v29  ;;  %v4601_v29 = vpack.c.bf16 %v3262_v28, %v3261_v17  ;;  %v5884_v17 = vld [vmem:[#allocation2 + $0x122] sm:$0xff] }
  0x7a   : > { %4266 = vmatmul.mubr.f32.gmra.mrb[16].mxu0 %v5852_v46  ;;  %4596 = vmatpush3.bf16.msra.mxu1 %v5715_v5  ;;  %v3264_v5 = vld [vmem:[%s6334_s2 + $0x138] sm:$0xff]  ;;  %6379 = vst [vmem:[#allocation20_spill] sm:$0xff] %v5884_v17  ;;  %v3265_v28 = vld [vmem:[%s6334_s2 + $0x140] sm:$0xff] }
  0x7b   : > { %3924 = vmatprep.mubr.f32.mxu1 %v5402_v30  ;;  %4268 = vmatprep.mubr.f32.mxu0 %v5854_v25  ;;  %v5882_v30 = vld [vmem:[#allocation2 + $0x112] sm:$0xff] }
  0x7c   : > { %4598 = vmatprep.subr.bf16.mxu1 %v4597_v50  ;;  %6378 = vst [vmem:[#allocation19_spill] sm:$0xff] %v5882_v30 }
  0x7d   : > { %3925 = vmatmul.mubr.f32.gmra.mrb[2].mxu1 %v5405_v31  ;;  %v4605_v31 = vpack.c.bf16 %v3264_v5, %v3263_v26  ;;  %v5898_v26 = vld [vmem:[#allocation2 + $0x13a] sm:$0xff]  ;;  %v4609_v5 = vpack.c.bf16 %v3266_v12, %v3265_v28  ;;  %v5912_v12 = vld [vmem:[#allocation2 + $0x152] sm:$0xff] }
  0x7e   : > { %4269 = vmatmul.mubr.f32.gmra.mrb[18].mxu0 %v5868_v37  ;;  %3927 = vmatprep.mubr.f32.mxu1 %v5423_v38  ;;  %6381 = vst [vmem:[#allocation22_spill] sm:$0xff] %v5898_v26  ;;  %6383 = vst [vmem:[#allocation24_spill] sm:$0xff] %v5912_v12  ;;  %v382_v37 = vld [vmem:[%s5720_s19 + $0x28] sm:$0x3] }
  0x7f   : > { %4271 = vmatprep.mubr.f32.mxu0 %v5870_v6  ;;  %4600 = vmatpush3.bf16.msra.mxu1 %v4597_v50  ;;  %v5896_v50 = vld [vmem:[#allocation2 + $0x12a] sm:$0xff]  ;;  %389 = vst [vmem:[#allocation2 + $0x1a8] sm:$0x3] %v382_v37 }
  0x80   : > { %4602 = vmatprep.subr.bf16.mxu1 %v4601_v29  ;;  %6380 = vst [vmem:[#allocation21_spill] sm:$0xff] %v5896_v50  ;;  %v3267_v6 = vld [vmem:[%s6334_s2 + $0x150] sm:$0xff] }
  0x81   : > { %3928 = vmatmul.mubr.f32.gmra.mrb[4].mxu1 %v5426_v39  ;;  %v1887_v37 = vld [vmem:[#allocation2 + $0x18a] sm:$0xff] }
  0x82   : > { %4272 = vmatmul.mubr.f32.gmra.mrb[20].mxu0 %v5882_v30  ;;  %3930 = vmatprep.mubr.f32.mxu1 %v5438_v43  ;;  %v3268_v30 = vld [vmem:[%s6334_s2 + $0x158] sm:$0xff] }
  0x83   : > { %4274 = vmatprep.mubr.f32.mxu0 %v5884_v17  ;;  %4604 = vmatpush3.bf16.msra.mxu1 %v4601_v29  ;;  %v5910_v29 = vld [vmem:[#allocation2 + $0x142] sm:$0xff]  ;;  %v4613_v28 = vpack.c.bf16 %v3268_v30, %v3267_v6  ;;  %v5926_v6 = vld [vmem:[#allocation2 + $0x16a] sm:$0xff] }
  0x84   : > { %4606 = vmatprep.subr.bf16.mxu1 %v4605_v31  ;;  %6382 = vst [vmem:[#allocation23_spill] sm:$0xff] %v5910_v29  ;;  %v3269_v17 = vld [vmem:[%s6334_s2 + $0x160] sm:$0xff] }
  0x85   : > { %3931 = vmatmul.mubr.f32.gmra.mrb[6].mxu1 %v5444_v45 }
  0x86   : > { %4275 = vmatmul.mubr.f32.gmra.mrb[22].mxu0 %v5896_v50  ;;  %3933 = vmatprep.mubr.f32.mxu1 %v5460_v51  ;;  %v3270_v50 = vld [vmem:[%s6334_s2 + $0x168] sm:$0xff] }
  0x87   : > { %4277 = vmatprep.mubr.f32.mxu0 %v5898_v26  ;;  %4608 = vmatpush3.bf16.msra.mxu1 %v4605_v31  ;;  %v5924_v31 = vld [vmem:[#allocation2 + $0x15a] sm:$0xff]  ;;  %v4617_v30 = vpack.c.bf16 %v3270_v50, %v3269_v17  ;;  %v3271_v26 = vld [vmem:[%s6334_s2 + $0x170] sm:$0xff]  ;;  %v1886_v17 = vld [vmem:[#allocation2 + $0x182] sm:$0xff] }
  0x88   : > { %4610 = vmatprep.subr.bf16.mxu1 %v4609_v5  ;;  %6384 = vst [vmem:[#allocation25_spill] sm:$0xff] %v5924_v31 }
  0x89   : > { %3934 = vmatmul.mubr.f32.gmra.mrb[8].mxu1 %v5463_v52 }
  0x8a   : > { %4278 = vmatmul.mubr.f32.gmra.mrb[24].mxu0 %v5910_v29  ;;  %3936 = vmatprep.mubr.f32.mxu1 %v5474_v57  ;;  %v3272_v29 = vld [vmem:[%s6334_s2 + $0x178] sm:$0xff] }
  0x8b   : > { %4280 = vmatprep.mubr.f32.mxu0 %v5912_v12  ;;  %4612 = vmatpush3.bf16.msra.mxu1 %v4609_v5  ;;  %v5939_v5 = vld [vmem:[#allocation2 + $0x172] sm:$0xff]  ;;  %v4621_v50 = vpack.c.bf16 %v3272_v29, %v3271_v26  ;;  %v3273_v12 = vld [vmem:[%s6334_s2 + $0x180] sm:$0xff] }
  0x8c   : > { %4614 = vmatprep.subr.bf16.mxu1 %v4613_v28  ;;  %v3339_v26 = vld [vmem:[%s6334_s2 + $0x390] sm:$0xff]  ;;  %v3340_v29 = vld [vmem:[%s6334_s2 + $0x398] sm:$0xff] }
  0x8d   : > { %3937 = vmatmul.mubr.f32.gmra.mrb[10].mxu1 %v5478_v59 }
  0x8e   : > { %4281 = vmatmul.mubr.f32.gmra.mrb[26].mxu0 %v5924_v31  ;;  %3939 = vmatprep.mubr.f32.mxu1 %v5500_v2  ;;  %v3274_v31 = vld [vmem:[%s6334_s2 + $0x188] sm:$0xff] }
  0x8f   : > { %4283 = vmatprep.mubr.f32.mxu0 %v5926_v6  ;;  %4616 = vmatpush3.bf16.msra.mxu1 %v4613_v28  ;;  %v5950_v28 = vpack.c.bf16 %v3274_v31, %v3273_v12  ;;  %v3341_v12 = vld [vmem:[%s6334_s2 + $0x3a0] sm:$0xff]  ;;  %v3342_v31 = vld [vmem:[%s6334_s2 + $0x3a8] sm:$0xff] }
  0x90   : > { %4618 = vmatprep.subr.bf16.mxu1 %v4617_v30 }
  0x91   : > { %3940 = vmatmul.mubr.f32.gmra.mrb[12].mxu1 %v5503_v3 }
  0x92   : > { %4284 = vmatmul.mubr.f32.gmra.mrb[28].mxu0 %v5939_v5  ;;  %3942 = vmatprep.mubr.f32.mxu1 %v5525_v13 }
  0x93   : > { %4286 = vmatprep.mubr.f32.mxu0 %v1886_v17  ;;  %4620 = vmatpush3.bf16.msra.mxu1 %v4617_v30  ;;  %v4757_v30 = vpack.c.bf16 %v3340_v29, %v3339_v26  ;;  %v3343_v17 = vld [vmem:[%s6334_s2 + $0x3b0] sm:$0xff]  ;;  %v3350_v26 = vld [vmem:[%s6334_s2 + $0x3e8] sm:$0xff]  ;;  %v3352_v29 = vld [vmem:[%s6334_s2 + $0x3f8] sm:$0xff] }
  0x94   : > { %4622 = vmatprep.subr.bf16.mxu1 %v4621_v50 }
  0x95   : > { %3943 = vmatmul.mubr.f32.gmra.mrb[14].mxu1 %v5528_v14 }
  0x96   : > { %4287 = vmatmul.mubr.f32.gmra.mrb[30].mxu0 %v1887_v37  ;;  %3945 = vmatprep.mubr.f32.mxu1 %v5535_v18  ;;  %v3348_v37 = vld [vmem:[%s6334_s2 + $0x3d8] sm:$0xff] }
  0x97   : > { %4321 = vmatprep.mubr.f32.mxu0 %v5423_v38  ;;  %4624 = vmatpush3.bf16.msra.mxu1 %v4621_v50  ;;  %v4761_v38 = vpack.c.bf16 %v3342_v31, %v3341_v12  ;;  %v3344_v50 = vld [vmem:[%s6334_s2 + $0x3b8] sm:$0xff]  ;;  %v3275_v12 = vld [vmem:[%s6334_s2 + $0x190] sm:$0xff] }
  0x98   : > { %4626 = vmatprep.subr.bf16.mxu1 %v5950_v28  ;;  %v3276_v31 = vld [vmem:[%s6334_s2 + $0x198] sm:$0xff] }
  0x99   : > { %3946 = vmatmul.mubr.f32.gmra.mrb[16].mxu1 %v5539_v20 }
  0x9a   : > { %4322 = vmatmul.mubr.f32.vlgmr.msra.gmra.mrb[0].mxu0 %v5426_v39  ;;  %3948 = vmatprep.mubr.f32.mxu1 %v5561_v35  ;;  %v4765_v39 = vpack.c.bf16 %v3344_v50, %v3343_v17  ;;  %v3278_v17 = vld [vmem:[%s6334_s2 + $0x1a8] sm:$0xff]  ;;  %v3280_v50 = vld [vmem:[%s6334_s2 + $0x1b8] sm:$0xff] }
  0x9b   : > { %4756 = vmatpush3.bf16.msra.mxu0 %v5840_v0  ;;  %4324 = vmatprep.mubr.f32.mxu0 %v5438_v43  ;;  %v3345_v43 = vld [vmem:[%s6334_s2 + $0x3c0] sm:$0xff]  ;;  %v3346_v0 = vld [vmem:[%s6334_s2 + $0x3c8] sm:$0xff] }
  0x9c   : > { %4758 = vmatprep.subr.bf16.mxu0 %v4757_v30 }
  0x9d   : > { %3949 = vmatmul.mubr.f32.gmra.mrb[18].mxu1 %v5564_v36 }
  0x9e   : > { %4325 = vmatmul.mubr.f32.gmra.mrb[2].mxu0 %v5444_v45  ;;  %3951 = vmatprep.mubr.f32.mxu1 %v5579_v48  ;;  %v4769_v45 = vpack.c.bf16 %v3346_v0, %v3345_v43  ;;  %v6387_v43 = vld [vmem:[#allocation19_spill] sm:$0xff]  ;;  %v3363_v0 = vld [vmem:[%s6334_s2 + $0x450] sm:$0xff] }
  0x9f   : > { %4327 = vmatprep.mubr.f32.mxu0 %v5460_v51  ;;  %4760 = vmatpush3.bf16.msra.mxu0 %v4757_v30  ;;  %v3347_v51 = vld [vmem:[%s6334_s2 + $0x3d0] sm:$0xff]  ;;  %v3354_v30 = vld [vmem:[%s6334_s2 + $0x408] sm:$0xff] }
  0xa0   : > { %4762 = vmatprep.subr.bf16.mxu0 %v4761_v38 }
  0xa1   : > { %3952 = vmatmul.mubr.f32.gmra.mrb[20].mxu1 %v5583_v53 }
  0xa2   : > { %4328 = vmatmul.mubr.f32.gmra.mrb[4].mxu0 %v5463_v52  ;;  %3954 = vmatprep.mubr.f32.mxu1 %v5601_v1  ;;  %v4773_v52 = vpack.c.bf16 %v3348_v37, %v3347_v51  ;;  %v6388_v51 = vld [vmem:[#allocation20_spill] sm:$0xff] }
  0xa3   : > { %4330 = vmatprep.mubr.f32.mxu0 %v5474_v57  ;;  %4764 = vmatpush3.bf16.msra.mxu0 %v4761_v38  ;;  %v3349_v57 = vld [vmem:[%s6334_s2 + $0x3e0] sm:$0xff] }
  0xa4   : > { %4766 = vmatprep.subr.bf16.mxu0 %v4765_v39  ;;  %v3277_v38 = vld [vmem:[%s6334_s2 + $0x1a0] sm:$0xff] }
  0xa5   : > { %3955 = vmatmul.mubr.f32.gmra.mrb[22].mxu1 %v5604_v4  ;;  %v2478_v37 = vld [vmem:[#allocation2 + $0x99] sm:$0xff] }
  0xa6   : > { %4331 = vmatmul.mubr.f32.gmra.mrb[6].mxu0 %v5478_v59  ;;  %3957 = vmatprep.mubr.f32.mxu1 %v5610_v11  ;;  %v4777_v59 = vpack.c.bf16 %v3350_v26, %v3349_v57  ;;  %v6389_v26 = vld [vmem:[#allocation21_spill] sm:$0xff] }
  0xa7   : > { %4333 = vmatprep.mubr.f32.mxu0 %v5500_v2  ;;  %4768 = vmatpush3.bf16.msra.mxu0 %v4765_v39  ;;  %v3351_v2 = vld [vmem:[%s6334_s2 + $0x3f0] sm:$0xff] }
  0xa8   : > { %4770 = vmatprep.subr.bf16.mxu0 %v4769_v45 }
  0xa9   : > { %3958 = vmatmul.mubr.f32.gmra.mrb[24].mxu1 %v5613_v15 }
  0xaa   : > { %4334 = vmatmul.mubr.f32.gmra.mrb[8].mxu0 %v5503_v3  ;;  %3960 = vmatprep.mubr.f32.mxu1 %v5634_v34  ;;  %v4781_v3 = vpack.c.bf16 %v3352_v29, %v3351_v2  ;;  %v3366_v2 = vld [vmem:[%s6334_s2 + $0x468] sm:$0xff]  ;;  %v6390_v29 = vld [vmem:[#allocation22_spill] sm:$0xff] }
  0xab   : > { %4336 = vmatprep.mubr.f32.mxu0 %v5525_v13  ;;  %4772 = vmatpush3.bf16.msra.mxu0 %v4769_v45  ;;  %v3353_v13 = vld [vmem:[%s6334_s2 + $0x400] sm:$0xff]  ;;  %v3364_v45 = vld [vmem:[%s6334_s2 + $0x458] sm:$0xff] }
  0xac   : > { %4774 = vmatprep.subr.bf16.mxu0 %v4773_v52  ;;  %v4805_v57 = vpack.c.bf16 %v3364_v45, %v3363_v0  ;;  %v2776_v0 = vld [vmem:[#allocation2 + $0x3a] sm:$0xff]  ;;  %v1262_v45 = vld [vmem:[#allocation2 + $0xf0] sm:$0xff] }
  0xad   : > { %3961 = vmatmul.mubr.f32.gmra.mrb[26].mxu1 %v5637_v40 }
  0xae   : > { %4337 = vmatmul.mubr.f32.gmra.mrb[10].mxu0 %v5528_v14  ;;  %3963 = vmatprep.mubr.f32.mxu1 %v5652_v49  ;;  %v937_v14 = vld [vmem:[#allocation2 + $0x2] sm:$0xff] }
  0xaf   : > { %4339 = vmatprep.mubr.f32.mxu0 %v5535_v18  ;;  %4776 = vmatpush3.bf16.msra.mxu0 %v4773_v52  ;;  %v6033_v18 = vpack.c.bf16 %v3354_v30, %v3353_v13  ;;  %v2479_v52 = vld [vmem:[#allocation2 + $0xa9] sm:$0xff]  ;;  %v2481_v13 = vld [vmem:[#allocation2 + $0xc1] sm:$0xff] }
  0xb0   : > { %4778 = vmatprep.subr.bf16.mxu0 %v4777_v59 }
  0xb1   : > { %3964 = vmatmul.mubr.f32.gmra.mrb[28].mxu1 %v5655_v54 }
  0xb2   : > { %4340 = vmatmul.mubr.f32.gmra.mrb[12].mxu0 %v5539_v20  ;;  %3966 = vmatprep.mubr.f32.mxu1 %v5673_v9  ;;  %v938_v20 = vld [vmem:[#allocation2 + $0xa] sm:$0xff] }
  0xb3   : > { %4342 = vmatprep.mubr.f32.mxu0 %v5561_v35  ;;  %4780 = vmatpush3.bf16.msra.mxu0 %v4777_v59  ;;  %v4629_v35 = vpack.c.bf16 %v3276_v31, %v3275_v12  ;;  %v3365_v59 = vld [vmem:[%s6334_s2 + $0x460] sm:$0xff]  ;;  %v3368_v12 = vld [vmem:[%s6334_s2 + $0x478] sm:$0xff] }
  0xb4   : > { %4782 = vmatprep.subr.bf16.mxu0 %v4781_v3  ;;  %v4809_v30 = vpack.c.bf16 %v3366_v2, %v3365_v59  ;;  %v6392_v31 = vld [vmem:[#allocation24_spill] sm:$0xff]  ;;  %v1265_v59 = vld [vmem:[#allocation2 + $0x110] sm:$0xff] }
  0xb5   : > { %3967 = vmatmul.mubr.f32.gmra.mrb[30].mxu1 %v5676_v10  ;;  %v2780_v2 = vld [vmem:[#allocation2 + $0x6a] sm:$0xff] }
  0xb6   : > { %4343 = vmatmul.mubr.f32.gmra.mrb[14].mxu0 %v5564_v36  ;;  %4001 = vmatprep.mubr.f32.mxu1 %v937_v14  ;;  %v4633_v36 = vpack.c.bf16 %v3278_v17, %v3277_v38  ;;  %v6391_v14 = vld [vmem:[#allocation23_spill] sm:$0xff]  ;;  %v6393_v17 = vld [vmem:[#allocation25_spill] sm:$0xff] }
  0xb7   : > { %4345 = vmatprep.mubr.f32.mxu0 %v5579_v48  ;;  %4784 = vmatpush3.bf16.msra.mxu0 %v4781_v3  ;;  %v3279_v48 = vld [vmem:[%s6334_s2 + $0x1b0] sm:$0xff] }
  0xb8   : > { %4786 = vmatprep.subr.bf16.mxu0 %v6033_v18  ;;  %v2480_v3 = vld [vmem:[#allocation2 + $0xb1] sm:$0xff] }
  0xb9   : > { %4002 = vmatmul.mubr.f32.vlgmr.msra.gmra.mrb[0].mxu1 %v938_v20  ;;  %v2482_v20 = vld [vmem:[#allocation2 + $0xc9] sm:$0xff] }
  0xba   : > { %4346 = vmatmul.mubr.f32.gmra.mrb[16].mxu0 %v5583_v53  ;;  %4628 = vmatpush3.bf16.msra.mxu1 %v5950_v28  ;;  %v4637_v53 = vpack.c.bf16 %v3280_v50, %v3279_v48  ;;  %v2477_v28 = vld [vmem:[#allocation2 + $0x91] sm:$0xff] }
  0xbb   : > { %4004 = vmatprep.mubr.f32.mxu1 %v5707_v61  ;;  %4348 = vmatprep.mubr.f32.mxu0 %v5601_v1  ;;  %v3281_v1 = vld [vmem:[%s6334_s2 + $0x1c0] sm:$0xff]  ;;  %v3282_v61 = vld [vmem:[%s6334_s2 + $0x1c8] sm:$0xff]  ;;  %v1244_v48 = vld [vmem:[#allocation2 + $0x18] sm:$0xff] }
  0xbc   : > { %4630 = vmatprep.subr.bf16.mxu1 %v4629_v35  ;;  %v6175_v50 = vld [vmem:[#allocation2 + $0xf1] sm:$0xff] }
  0xbd   : > { %4005 = vmatmul.mubr.f32.gmra.mrb[2].mxu1 %v5723_v8  ;;  %v3284_v8 = vld [vmem:[%s6334_s2 + $0x1d8] sm:$0xff] }
  0xbe   : > { %4349 = vmatmul.mubr.f32.gmra.mrb[18].mxu0 %v5604_v4  ;;  %4007 = vmatprep.mubr.f32.mxu1 %v5725_v19  ;;  %v4641_v4 = vpack.c.bf16 %v3282_v61, %v3281_v1  ;;  %v3286_v19 = vld [vmem:[%s6334_s2 + $0x1e8] sm:$0xff]  ;;  %v6180_v1 = vld [vmem:[#allocation2 + $0xf9] sm:$0xff] }
  0xbf   : > { %4351 = vmatprep.mubr.f32.mxu0 %v5610_v11  ;;  %4632 = vmatpush3.bf16.msra.mxu1 %v4629_v35  ;;  %v3283_v11 = vld [vmem:[%s6334_s2 + $0x1d0] sm:$0xff]  ;;  %v6168_v35 = vld [vmem:[#allocation2 + $0xd9] sm:$0xff] }
  0xc0   : > { %4634 = vmatprep.subr.bf16.mxu1 %v4633_v36  ;;  %v6182_v61 = vld [vmem:[#allocation2 + $0x109] sm:$0xff] }
  0xc1   : > { %4008 = vmatmul.mubr.f32.gmra.mrb[4].mxu1 %v5745_v33  ;;  %v3288_v33 = vld [vmem:[%s6334_s2 + $0x1f8] sm:$0xff] }
  0xc2   : > { %4352 = vmatmul.mubr.f32.gmra.mrb[20].mxu0 %v5613_v15  ;;  %4010 = vmatprep.mubr.f32.mxu1 %v5747_v42  ;;  %v4645_v15 = vpack.c.bf16 %v3284_v8, %v3283_v11  ;;  %v2471_v42 = vld [vmem:[#allocation2 + $0x49] sm:$0xff]  ;;  %v6189_v8 = vld [vmem:[#allocation2 + $0x121] sm:$0xff] }
  0xc3   : > { %4354 = vmatprep.mubr.f32.mxu0 %v5634_v34  ;;  %4636 = vmatpush3.bf16.msra.mxu1 %v4633_v36  ;;  %v3285_v34 = vld [vmem:[%s6334_s2 + $0x1e0] sm:$0xff]  ;;  %v1248_v11 = vld [vmem:[#allocation2 + $0x48] sm:$0xff] }
  0xc4   : > { %4638 = vmatprep.subr.bf16.mxu1 %v4637_v53  ;;  %v6173_v36 = vld [vmem:[#allocation2 + $0xe1] sm:$0xff] }
  0xc5   : > { %4011 = vmatmul.mubr.f32.gmra.mrb[6].mxu1 %v5757_v58 }
  0xc6   : > { %4355 = vmatmul.mubr.f32.gmra.mrb[22].mxu0 %v5637_v40  ;;  %4013 = vmatprep.mubr.f32.mxu1 %v5759_v62  ;;  %v4649_v40 = vpack.c.bf16 %v3286_v19, %v3285_v34  ;;  %v3357_v62 = vld [vmem:[%s6334_s2 + $0x420] sm:$0xff]  ;;  %v1249_v34 = vld [vmem:[#allocation2 + $0x50] sm:$0xff] }
  0xc7   : > { %4357 = vmatprep.mubr.f32.mxu0 %v5652_v49  ;;  %4640 = vmatpush3.bf16.msra.mxu1 %v4637_v53  ;;  %v3287_v49 = vld [vmem:[%s6334_s2 + $0x1f0] sm:$0xff]  ;;  %v1245_v53 = vld [vmem:[#allocation2 + $0x20] sm:$0xff] }
  0xc8   : > { %4642 = vmatprep.subr.bf16.mxu1 %v4641_v4  ;;  %v6194_v19 = vld [vmem:[#allocation2 + $0x129] sm:$0xff] }
  0xc9   : > { %4014 = vmatmul.mubr.f32.gmra.mrb[8].mxu1 %v5769_v24  ;;  %v3358_v24 = vld [vmem:[%s6334_s2 + $0x428] sm:$0xff] }
  0xca   : > { %4358 = vmatmul.mubr.f32.gmra.mrb[24].mxu0 %v5655_v54  ;;  %4016 = vmatprep.mubr.f32.mxu1 %v5771_v27  ;;  %v4653_v54 = vpack.c.bf16 %v3288_v33, %v3287_v49  ;;  %v2472_v27 = vld [vmem:[#allocation2 + $0x51] sm:$0xff]  ;;  %v1251_v33 = vld [vmem:[#allocation2 + $0x68] sm:$0xff] }
  0xcb   : > { %4360 = vmatprep.mubr.f32.mxu0 %v5673_v9  ;;  %4644 = vmatpush3.bf16.msra.mxu1 %v4641_v4  ;;  %v2469_v9 = vld [vmem:[#allocation2 + $0x31] sm:$0xff] }
  0xcc   : > { %4646 = vmatprep.subr.bf16.mxu1 %v4645_v15  ;;  %v1247_v4 = vld [vmem:[#allocation2 + $0x38] sm:$0xff] }
  0xcd   : > { %4017 = vmatmul.mubr.f32.gmra.mrb[10].mxu1 %v5789_v56  ;;  %v3359_v56 = vld [vmem:[%s6334_s2 + $0x430] sm:$0xff]  ;;  %v6395_v49 = vld [vmem:[#allocation7_spill] sm:$0xff] }
  0xce   : > { %4361 = vmatmul.mubr.f32.gmra.mrb[26].mxu0 %v5676_v10  ;;  %4019 = vmatprep.mubr.f32.mxu1 %v5791_v16  ;;  %v3355_v10 = vld [vmem:[%s6334_s2 + $0x410] sm:$0xff]  ;;  %v3360_v16 = vld [vmem:[%s6334_s2 + $0x438] sm:$0xff] }
  0xcf   : > { %4363 = vmatprep.mubr.f32.mxu0 %v5728_v22  ;;  %4648 = vmatpush3.bf16.msra.mxu1 %v4645_v15  ;;  %v3356_v22 = vld [vmem:[%s6334_s2 + $0x418] sm:$0xff]  ;;  %v6394_v15 = vld [vmem:[#allocation6_spill] sm:$0xff] }
  0xd0   : > { %4650 = vmatprep.subr.bf16.mxu1 %v4649_v40  ;;  %v4789_v58 = vpack.c.bf16 %v3356_v22, %v3355_v10  ;;  %v6396_v10 = vld [vmem:[#allocation8_spill] sm:$0xff] }
  0xd1   : > { %4020 = vmatmul.mubr.f32.gmra.mrb[12].mxu1 %v5801_v63  ;;  %v2474_v63 = vld [vmem:[#allocation2 + $0x69] sm:$0xff]  ;;  %v1253_v22 = vld [vmem:[#allocation2 + $0x80] sm:$0xff] }
  0xd2   : > { %4364 = vmatmul.mubr.f32.gmra.mrb[28].mxu0 %v5731_v23  ;;  %4022 = vmatprep.mubr.f32.mxu1 %v5805_v41  ;;  %v2470_v23 = vld [vmem:[#allocation2 + $0x39] sm:$0xff] }
  0xd3   : > { %4366 = vmatprep.mubr.f32.mxu0 %v5780_v47  ;;  %4652 = vmatpush3.bf16.msra.mxu1 %v4649_v40  ;;  %v2473_v47 = vld [vmem:[#allocation2 + $0x61] sm:$0xff]  ;;  %v2475_v41 = vld [vmem:[#allocation2 + $0x79] sm:$0xff] }
  0xd4   : > { %4654 = vmatprep.subr.bf16.mxu1 %v4653_v54  ;;  %v6197_v40 = vld [vmem:[#allocation2 + $0x139] sm:$0xff] }
  0xd5   : > { %4023 = vmatmul.mubr.f32.gmra.mrb[14].mxu1 %v5818_v32  ;;  %v4797_v32 = vpack.c.bf16 %v3360_v16, %v3359_v56  ;;  %v6401_v56 = vld [vmem:[#allocation10_spill] sm:$0xff]  ;;  %v6402_v16 = vld [vmem:[#allocation16_spill] sm:$0xff] }
  0xd6   : > { %4367 = vmatmul.mubr.f32.gmra.mrb[30].mxu0 %v5783_v55  ;;  %4025 = vmatprep.mubr.f32.mxu1 %v5822_v60  ;;  %v4793_v55 = vpack.c.bf16 %v3358_v24, %v3357_v62  ;;  %v6385_v60 = vld [vmem:[#allocation17_spill] sm:$0xff]  ;;  %v6399_v62 = vld [vmem:[#allocation14_spill] sm:$0xff]  ;;  %v1255_v24 = vld [vmem:[#allocation2 + $0x98] sm:$0xff] }
  0xd7   : > { %4401 = vmatprep.mubr.f32.mxu0 %v2469_v9  ;;  %4656 = vmatpush3.bf16.msra.mxu1 %v4653_v54  ;;  %v6202_v54 = vld [vmem:[#allocation2 + $0x141] sm:$0xff]  ;;  %v1252_v9 = vld [vmem:[#allocation2 + $0x78] sm:$0xff] }
  0xd8   : > { %4817 = vmatprep.subr.bf16.mxu1 %v5328_v7 }
  0xd9   : > { %4026 = vmatmul.mubr.f32.gmra.mrb[16].mxu1 %v5836_v21  ;;  %v3361_v21 = vld [vmem:[%s6334_s2 + $0x440] sm:$0xff] }
  0xda   : > { %4402 = vmatmul.mubr.f32.vlgmr.msra.gmra.mrb[0].mxu0 %v2470_v23  ;;  %4028 = vmatprep.mubr.f32.mxu1 %v5838_v44  ;;  %v3362_v44 = vld [vmem:[%s6334_s2 + $0x448] sm:$0xff] }
  0xdb   : > { %4788 = vmatpush3.bf16.msra.mxu0 %v6033_v18  ;;  %4404 = vmatprep.mubr.f32.mxu0 %v2471_v42  ;;  %v4801_v39 = vpack.c.bf16 %v3362_v44, %v3361_v21  ;;  %v3367_v18 = vld [vmem:[%s6334_s2 + $0x470] sm:$0xff]  ;;  %v6397_v23 = vld [vmem:[#allocation13_spill] sm:$0xff]  ;;  %v6403_v21 = vld [vmem:[#allocation11_spill] sm:$0xff] }
  0xdc   : > { %4790 = vmatprep.subr.bf16.mxu0 %v4789_v58  ;;  %v4813_v38 = vpack.c.bf16 %v3368_v12, %v3367_v18  ;;  %v1254_v42 = vld [vmem:[#allocation2 + $0x90] sm:$0xff]  ;;  %v1259_v44 = vld [vmem:[#allocation2 + $0xc8] sm:$0xff]  ;;  %v1269_v12 = vld [vmem:[#allocation2 + $0x140] sm:$0xff] }
  0xdd   : > { %4029 = vmatmul.mubr.f32.gmra.mrb[18].mxu1 %v5852_v46  ;;  %v6386_v46 = vld [vmem:[#allocation18_spill] sm:$0xff] }
  0xde   : > { %4405 = vmatmul.mubr.f32.gmra.mrb[2].mxu0 %v2472_v27  ;;  %4031 = vmatprep.mubr.f32.mxu1 %v5854_v25  ;;  %v2476_v25 = vld [vmem:[#allocation2 + $0x81] sm:$0xff]  ;;  %v6400_v27 = vld [vmem:[#allocation15_spill] sm:$0xff] }
  0xdf   : > { %4407 = vmatprep.mubr.f32.mxu0 %v2473_v47  ;;  %4792 = vmatpush3.bf16.msra.mxu0 %v4789_v58  ;;  %v6398_v58 = vld [vmem:[#allocation9_spill] sm:$0xff]  ;;  %v2783_v18 = vld [vmem:[#allocation2 + $0x92] sm:$0xff] }
  0xe0   : > { %4794 = vmatprep.subr.bf16.mxu0 %v4793_v55  ;;  %v1256_v47 = vld [vmem:[#allocation2 + $0xa8] sm:$0xff] }
  0xe1   : > { %4032 = vmatmul.mubr.f32.gmra.mrb[20].mxu1 %v6385_v60  ;;  %v2499_v60 = vld [vmem:[#allocation2 + $0x199] sm:$0xff] }
  0xe2   : > { %4408 = vmatmul.mubr.f32.gmra.mrb[4].mxu0 %v2474_v63  ;;  %4034 = vmatprep.mubr.f32.mxu1 %v6386_v46  ;;  %v1257_v63 = vld [vmem:[#allocation2 + $0xb0] sm:$0xff]  ;;  %v2500_v46 = vld [vmem:[#allocation2 + $0x1a1] sm:$0xff] }
  0xe3   : > { %4410 = vmatprep.mubr.f32.mxu0 %v2475_v41  ;;  %4796 = vmatpush3.bf16.msra.mxu0 %v4793_v55  ;;  %v6213_v55 = vld [vmem:[#allocation2 + $0x181] sm:$0xff]  ;;  %v6218_v41 = vld [vmem:[#allocation2 + $0x189] sm:$0xff] }
  0xe4   : > { %4798 = vmatprep.subr.bf16.mxu0 %v4797_v32 }
  0xe5   : > { %4035 = vmatmul.mubr.f32.gmra.mrb[22].mxu1 %v6387_v43  ;;  %v1261_v43 = vld [vmem:[#allocation2 + $0xe0] sm:$0xff] }
  0xe6   : > { %4411 = vmatmul.mubr.f32.gmra.mrb[6].mxu0 %v2476_v25  ;;  %4037 = vmatprep.mubr.f32.mxu1 %v6388_v51  ;;  %v1260_v25 = vld [vmem:[#allocation2 + $0xd8] sm:$0xff]  ;;  %v2777_v51 = vld [vmem:[#allocation2 + $0x4a] sm:$0xff] }
  0xe7   : > { %4413 = vmatprep.mubr.f32.mxu0 %v2477_v28  ;;  %4800 = vmatpush3.bf16.msra.mxu0 %v4797_v32  ;;  %v1258_v32 = vld [vmem:[#allocation2 + $0xc0] sm:$0xff]  ;;  %v2775_v28 = vld [vmem:[#allocation2 + $0x32] sm:$0xff] }
  0xe8   : > { %4802 = vmatprep.subr.bf16.mxu0 %v4801_v39 }
  0xe9   : > { %4038 = vmatmul.mubr.f32.gmra.mrb[24].mxu1 %v6389_v26  ;;  %v2779_v26 = vld [vmem:[#allocation2 + $0x62] sm:$0xff] }
  0xea   : > { %4414 = vmatmul.mubr.f32.gmra.mrb[8].mxu0 %v2478_v37  ;;  %4040 = vmatprep.mubr.f32.mxu1 %v6390_v29  ;;  %v1263_v37 = vld [vmem:[#allocation2 + $0xf8] sm:$0xff]  ;;  %v1266_v29 = vld [vmem:[#allocation2 + $0x120] sm:$0xff] }
  0xeb   : > { %4416 = vmatprep.mubr.f32.mxu0 %v2479_v52  ;;  %4804 = vmatpush3.bf16.msra.mxu0 %v4801_v39  ;;  %v6404_v39 = vld [vmem:[#allocation12_spill] sm:$0xff]  ;;  %v2778_v52 = vld [vmem:[#allocation2 + $0x52] sm:$0xff] }
  0xec   : > { %4806 = vmatprep.subr.bf16.mxu0 %v4805_v57 }
  0xed   : > { %4041 = vmatmul.mubr.f32.gmra.mrb[26].mxu1 %v6391_v14  ;;  %v1268_v14 = vld [vmem:[#allocation2 + $0x138] sm:$0xff] }
  0xee   : > { %4417 = vmatmul.mubr.f32.gmra.mrb[10].mxu0 %v2480_v3  ;;  %4043 = vmatprep.mubr.f32.mxu1 %v6392_v31  ;;  %v2781_v3 = vld [vmem:[#allocation2 + $0x7a] sm:$0xff] }
  0xef   : > { %4419 = vmatprep.mubr.f32.mxu0 %v2481_v13  ;;  %4808 = vmatpush3.bf16.msra.mxu0 %v4805_v57  ;;  %v1264_v57 = vld [vmem:[#allocation2 + $0x108] sm:$0xff]  ;;  %v2784_v31 = vld [vmem:[#allocation2 + $0x9a] sm:$0xff] }
  0xf0   : > { %4810 = vmatprep.subr.bf16.mxu0 %v4809_v30  ;;  %v1267_v13 = vld [vmem:[#allocation2 + $0x128] sm:$0xff] }
  0xf1   : > { %4044 = vmatmul.mubr.f32.gmra.mrb[28].mxu1 %v6393_v17  ;;  %v1271_v17 = vld [vmem:[#allocation2 + $0x158] sm:$0xff] }
  0xf2   : > { %4420 = vmatmul.mubr.f32.gmra.mrb[12].mxu0 %v2482_v20  ;;  %4046 = vmatprep.mubr.f32.mxu1 %v5926_v6  ;;  %v1246_v6 = vld [vmem:[#allocation2 + $0x30] sm:$0xff] }
  0xf3   : > { %4422 = vmatprep.mubr.f32.mxu0 %v6168_v35  ;;  %4812 = vmatpush3.bf16.msra.mxu0 %v4809_v30  ;;  %v2782_v30 = vld [vmem:[#allocation2 + $0x82] sm:$0xff]  ;;  %v1270_v20 = vld [vmem:[#allocation2 + $0x150] sm:$0xff] }
  0xf4   : > { %4814 = vmatprep.subr.bf16.mxu0 %v4813_v38 }
  0xf5   : > { %4047 = vmatmul.mubr.f32.gmra.mrb[30].mxu1 %v5939_v5  ;;  %v6187_v5 = vld [vmem:[#allocation2 + $0x111] sm:$0xff] }
  0xf6   : > { %4423 = vmatmul.mubr.f32.gmra.mrb[14].mxu0 %v6173_v36  ;;  %4081 = vmatprep.mubr.f32.mxu1 %v1244_v48  ;;  %v2786_v48 = vld [vmem:[#allocation2 + $0xb2] sm:$0xff] }
  0xf7   : > { %4425 = vmatprep.mubr.f32.mxu0 %v6175_v50  ;;  %4816 = vmatpush3.bf16.msra.mxu0 %v4813_v38  ;;  %v2785_v38 = vld [vmem:[#allocation2 + $0xaa] sm:$0xff] }
  0xf9   : > { %4082 = vmatmul.mubr.f32.vlgmr.msra.gmra.mrb[0].mxu1 %v1245_v53  ;;  %v1272_v53 = vld [vmem:[#allocation2 + $0x168] sm:$0xff] }
  0xfa   : > { %4426 = vmatmul.mubr.f32.gmra.mrb[16].mxu0 %v6180_v1  ;;  %4825 = vmatpush3.bf16.msra.mxu1 %v5328_v7  ;;  %v1250_v7 = vld [vmem:[#allocation2 + $0x60] sm:$0xff] }
  0xfb   : > { %4084 = vmatprep.mubr.f32.mxu1 %v1246_v6  ;;  %4428 = vmatprep.mubr.f32.mxu0 %v6182_v61  ;;  %v2787_v6 = vld [vmem:[#allocation2 + $0xc2] sm:$0xff] }
  0xfc   : > { %4818 = vmatprep.subr.bf16.mxu1 %v6394_v15 }
  0xfd   : > { %4085 = vmatmul.mubr.f32.gmra.mrb[2].mxu1 %v1247_v4  ;;  %v1273_v4 = vld [vmem:[#allocation2 + $0x170] sm:$0xff] }
  0xfe   : > { %4429 = vmatmul.mubr.f32.gmra.mrb[18].mxu0 %v6187_v5  ;;  %4087 = vmatprep.mubr.f32.mxu1 %v1248_v11  ;;  %v2788_v11 = vld [vmem:[#allocation2 + $0xca] sm:$0xff] }
  0xff   : > { %4431 = vmatprep.mubr.f32.mxu0 %v6189_v8  ;;  %4826 = vmatpush3.bf16.msra.mxu1 %v6394_v15  ;;  %v2789_v15 = vld [vmem:[#allocation2 + $0xda] sm:$0xff] }
 0x100   : > { %4819 = vmatprep.subr.bf16.mxu1 %v6395_v49 }
 0x101   : > { %4088 = vmatmul.mubr.f32.gmra.mrb[4].mxu1 %v1249_v34  ;;  %v5149_v34 = vld [vmem:[#allocation2 + $0x180] sm:$0xff] }
 0x102   : > { %4432 = vmatmul.mubr.f32.gmra.mrb[20].mxu0 %v6194_v19  ;;  %4090 = vmatprep.mubr.f32.mxu1 %v1250_v7  ;;  %v2790_v7 = vld [vmem:[#allocation2 + $0xe2] sm:$0xff] }
 0x103   : > { %4434 = vmatprep.mubr.f32.mxu0 %v6197_v40  ;;  %4827 = vmatpush3.bf16.msra.mxu1 %v6395_v49  ;;  %v2791_v49 = vld [vmem:[#allocation2 + $0xf2] sm:$0xff] }
 0x104   : > { %4820 = vmatprep.subr.bf16.mxu1 %v6396_v10 }
 0x105   : > { %4091 = vmatmul.mubr.f32.gmra.mrb[6].mxu1 %v1251_v33  ;;  %v5150_v33 = vld [vmem:[#allocation2 + $0x188] sm:$0xff] }
 0x106   : > { %4435 = vmatmul.mubr.f32.gmra.mrb[22].mxu0 %v6202_v54  ;;  %4093 = vmatprep.mubr.f32.mxu1 %v1252_v9  ;;  %v2792_v9 = vld [vmem:[#allocation2 + $0xfa] sm:$0xff] }
 0x107   : > { %4437 = vmatprep.mubr.f32.mxu0 %v6397_v23  ;;  %4828 = vmatpush3.bf16.msra.mxu1 %v6396_v10  ;;  %v2793_v10 = vld [vmem:[#allocation2 + $0x10a] sm:$0xff]  ;;  %v2795_v23 = vld [vmem:[#allocation2 + $0x122] sm:$0xff] }
 0x108   : > { %4821 = vmatprep.subr.bf16.mxu1 %v6398_v58 }
 0x109   : > { %4094 = vmatmul.mubr.f32.gmra.mrb[8].mxu1 %v1253_v22  ;;  %v2794_v22 = vld [vmem:[#allocation2 + $0x112] sm:$0xff] }
 0x10a   : > { %4438 = vmatmul.mubr.f32.gmra.mrb[24].mxu0 %v6399_v62  ;;  %4096 = vmatprep.mubr.f32.mxu1 %v1254_v42  ;;  %v2796_v42 = vld [vmem:[#allocation2 + $0x12a] sm:$0xff]  ;;  %v2802_v62 = vld [vmem:[#allocation2 + $0x172] sm:$0xff] }
 0x10b   : > { %4440 = vmatprep.mubr.f32.mxu0 %v6400_v27  ;;  %4829 = vmatpush3.bf16.msra.mxu1 %v6398_v58  ;;  %v2797_v58 = vld [vmem:[#allocation2 + $0x13a] sm:$0xff]  ;;  %v2804_v27 = vld [vmem:[#allocation2 + $0x18a] sm:$0xff] }
 0x10c   : > { %4822 = vmatprep.subr.bf16.mxu1 %v6401_v56 }
 0x10d   : > { %4097 = vmatmul.mubr.f32.gmra.mrb[10].mxu1 %v1255_v24  ;;  %v2803_v24 = vld [vmem:[#allocation2 + $0x182] sm:$0xff] }
 0x10e   : > { %4441 = vmatmul.mubr.f32.gmra.mrb[26].mxu0 %v6402_v16  ;;  %4099 = vmatprep.mubr.f32.mxu1 %v1256_v47 }
 0x10f   : > { %4443 = vmatprep.mubr.f32.mxu0 %v6213_v55  ;;  %4830 = vmatpush3.bf16.msra.mxu1 %v6401_v56 }
 0x110   : > { %4823 = vmatprep.subr.bf16.mxu1 %v6403_v21 }
 0x111   : > { %4100 = vmatmul.mubr.f32.gmra.mrb[12].mxu1 %v1257_v63 }
 0x112   : > { %4444 = vmatmul.mubr.f32.gmra.mrb[28].mxu0 %v6218_v41  ;;  %4102 = vmatprep.mubr.f32.mxu1 %v1258_v32 }
 0x113   : > { %4446 = vmatprep.mubr.f32.mxu0 %v2499_v60  ;;  %4831 = vmatpush3.bf16.msra.mxu1 %v6403_v21 }
 0x114   : > { %4824 = vmatprep.subr.bf16.mxu1 %v6404_v39 }
 0x115   : > { %4103 = vmatmul.mubr.f32.gmra.mrb[14].mxu1 %v1259_v44 }
 0x116   : > { %4447 = vmatmul.mubr.f32.gmra.mrb[30].mxu0 %v2500_v46  ;;  %4105 = vmatprep.mubr.f32.mxu1 %v1260_v25 }
 0x117   : > { %4481 = vmatprep.mubr.f32.mxu0 %v2775_v28  ;;  %4832 = vmatpush3.bf16.msra.mxu1 %v6404_v39 }
 0x119   : > { %4106 = vmatmul.mubr.f32.gmra.mrb[16].mxu1 %v1261_v43 }
 0x11a   : > { %4482 = vmatmul.mubr.f32.vlgmr.msra.gmra.mrb[0].mxu0 %v2776_v0  ;;  %4108 = vmatprep.mubr.f32.mxu1 %v1262_v45 }
 0x11b   : > { %4484 = vmatprep.mubr.f32.mxu0 %v2777_v51 }
 0x11d   : > { %4109 = vmatmul.mubr.f32.gmra.mrb[18].mxu1 %v1263_v37 }
 0x11e   : > { %4485 = vmatmul.mubr.f32.gmra.mrb[2].mxu0 %v2778_v52  ;;  %4111 = vmatprep.mubr.f32.mxu1 %v1264_v57 }
 0x11f   : > { %4487 = vmatprep.mubr.f32.mxu0 %v2779_v26 }
 0x121   : > { %4112 = vmatmul.mubr.f32.gmra.mrb[20].mxu1 %v1265_v59 }
 0x122   : > { %4488 = vmatmul.mubr.f32.gmra.mrb[4].mxu0 %v2780_v2  ;;  %4114 = vmatprep.mubr.f32.mxu1 %v1266_v29 }
 0x123   : > { %4490 = vmatprep.mubr.f32.mxu0 %v2781_v3 }
 0x125   : > { %4115 = vmatmul.mubr.f32.gmra.mrb[22].mxu1 %v1267_v13 }
 0x126   : > { %4491 = vmatmul.mubr.f32.gmra.mrb[6].mxu0 %v2782_v30  ;;  %4117 = vmatprep.mubr.f32.mxu1 %v1268_v14 }
 0x127   : > { %4493 = vmatprep.mubr.f32.mxu0 %v2783_v18 }
 0x129   : > { %4118 = vmatmul.mubr.f32.gmra.mrb[24].mxu1 %v1269_v12 }
 0x12a   : > { %4494 = vmatmul.mubr.f32.gmra.mrb[8].mxu0 %v2784_v31  ;;  %4120 = vmatprep.mubr.f32.mxu1 %v1270_v20 }
 0x12b   : > { %4496 = vmatprep.mubr.f32.mxu0 %v2785_v38 }
 0x12d   : > { %4121 = vmatmul.mubr.f32.gmra.mrb[26].mxu1 %v1271_v17 }
 0x12e   : > { %4497 = vmatmul.mubr.f32.gmra.mrb[10].mxu0 %v2786_v48  ;;  %4123 = vmatprep.mubr.f32.mxu1 %v1272_v53 }
 0x12f   : > { %4499 = vmatprep.mubr.f32.mxu0 %v2787_v6 }
 0x131   : > { %4124 = vmatmul.mubr.f32.gmra.mrb[28].mxu1 %v1273_v4 }
 0x132   : > { %4500 = vmatmul.mubr.f32.gmra.mrb[12].mxu0 %v2788_v11  ;;  %4126 = vmatprep.mubr.f32.mxu1 %v5149_v34 }
 0x133   : > { %4502 = vmatprep.mubr.f32.mxu0 %v2789_v15 }
 0x135   : > { %4127 = vmatmul.mubr.f32.gmra.mrb[30].mxu1 %v5150_v33 }
 0x136   : > { %4503 = vmatmul.mubr.f32.gmra.mrb[14].mxu0 %v2790_v7  ;;  %4185 = vmatprep.mubr.f32.mxu1 %v6168_v35  ;;  %v2798_v35 = vld [vmem:[#allocation2 + $0x142] sm:$0xff] }
 0x137   : > { %4505 = vmatprep.mubr.f32.mxu0 %v2791_v49 }
 0x139   : > { %4186 = vmatmul.mubr.f32.vlgmr.msra.gmra.mrb[16].mxu1 %v6173_v36  ;;  %v2799_v36 = vld [vmem:[#allocation2 + $0x152] sm:$0xff] }
 0x13a   : > { %4506 = vmatmul.mubr.f32.gmra.mrb[16].mxu0 %v2792_v9  ;;  %4188 = vmatprep.mubr.f32.mxu1 %v6175_v50  ;;  %v2800_v50 = vld [vmem:[#allocation2 + $0x15a] sm:$0xff] }
 0x13b   : > { %4508 = vmatprep.mubr.f32.mxu0 %v2793_v10 }
 0x13d   : > { %4189 = vmatmul.mubr.f32.gmra.mrb[18].mxu1 %v6180_v1  ;;  %v1576_v1 = vld [vmem:[#allocation2 + $0x151] sm:$0xff] }
 0x13e   : > { %4509 = vmatmul.mubr.f32.gmra.mrb[18].mxu0 %v2794_v22  ;;  %4191 = vmatprep.mubr.f32.mxu1 %v6182_v61  ;;  %v2801_v61 = vld [vmem:[#allocation2 + $0x16a] sm:$0xff] }
 0x13f   : > { %4511 = vmatprep.mubr.f32.mxu0 %v2795_v23 }
 0x141   : > { %4192 = vmatmul.mubr.f32.gmra.mrb[20].mxu1 %v6187_v5  ;;  %v1577_v5 = vld [vmem:[#allocation2 + $0x159] sm:$0xff] }
 0x142   : > { %4512 = vmatmul.mubr.f32.gmra.mrb[20].mxu0 %v2796_v42  ;;  %4194 = vmatprep.mubr.f32.mxu1 %v6189_v8  ;;  %v1578_v8 = vld [vmem:[#allocation2 + $0x169] sm:$0xff] }
 0x143   : > { %4514 = vmatprep.mubr.f32.mxu0 %v2797_v58 }
 0x145   : > { %4195 = vmatmul.mubr.f32.gmra.mrb[22].mxu1 %v6194_v19  ;;  %v1579_v19 = vld [vmem:[#allocation2 + $0x171] sm:$0xff] }
 0x146   : > { %4515 = vmatmul.mubr.f32.gmra.mrb[22].mxu0 %v2798_v35  ;;  %4197 = vmatprep.mubr.f32.mxu1 %v6197_v40  ;;  %v2805_v40 = vld [vmem:[#allocation2 + $0x19a] sm:$0xff] }
 0x147   : > { %4517 = vmatprep.mubr.f32.mxu0 %v2799_v36 }
 0x149   : > { %4198 = vmatmul.mubr.f32.gmra.mrb[24].mxu1 %v6202_v54  ;;  %v2806_v54 = vld [vmem:[#allocation2 + $0x1a2] sm:$0xff] }
 0x14a   : > { %4518 = vmatmul.mubr.f32.gmra.mrb[24].mxu0 %v2800_v50  ;;  %4200 = vmatprep.mubr.f32.mxu1 %v1576_v1 }
 0x14b   : > { %4520 = vmatprep.mubr.f32.mxu0 %v2801_v61 }
 0x14d   : > { %4201 = vmatmul.mubr.f32.gmra.mrb[26].mxu1 %v1577_v5 }
 0x14e   : > { %4521 = vmatmul.mubr.f32.gmra.mrb[26].mxu0 %v2802_v62  ;;  %4203 = vmatprep.mubr.f32.mxu1 %v1578_v8 }
 0x14f   : > { %4523 = vmatprep.mubr.f32.mxu0 %v2803_v24 }
 0x151   : > { %4204 = vmatmul.mubr.f32.gmra.mrb[28].mxu1 %v1579_v19 }
 0x152   : > { %4524 = vmatmul.mubr.f32.gmra.mrb[28].mxu0 %v2804_v27  ;;  %4206 = vmatprep.mubr.f32.mxu1 %v6213_v55 }
 0x153   : > { %4526 = vmatprep.mubr.f32.mxu0 %v2805_v40 }
 0x155   : > { %4207 = vmatmul.mubr.f32.gmra.mrb[30].mxu1 %v6218_v41 }
 0x156   : > { %4527 = vmatmul.mubr.f32.gmra.mrb[30].mxu0 %v2806_v54 }
 0x1cc   : > { %v4083_v47 = vpop.f32.mrb[0].mxu1 }
 0x1cd   : > { %v1359_v56 = vpop.f32.mrb[1].mxu1 }
 0x1d0   : > { %v4086_v16 = vpop.f32.mrb[2].mxu1 }
 0x1d1   : > { %v1369_v63 = vpop.f32.mrb[3].mxu1 }
 0x1d4   : > { %v4089_v32 = vpop.f32.mrb[4].mxu1 }
 0x1d5   : > { %v1379_v60 = vpop.f32.mrb[5].mxu1 }
 0x1d8   : > { %v4092_v21 = vpop.f32.mrb[6].mxu1 }
 0x1d9   : > { %v1389_v44 = vpop.f32.mrb[7].mxu1 }
 0x1dc   : > { %v4095_v46 = vpop.f32.mrb[8].mxu1 }
 0x1dd   : > { %v1399_v25 = vpop.f32.mrb[9].mxu1 }
 0x1e0   : > { %v4098_v28 = vpop.f32.mrb[10].mxu1 }
 0x1e1   : > { %v1409_v39 = vpop.f32.mrb[11].mxu1 }
 0x1e4   : > { %v4101_v55 = vpop.f32.mrb[12].mxu1 }
 0x1e5   : > { %v1419_v43 = vpop.f32.mrb[13].mxu1 }
 0x1e8   : > { %v4104_v0 = vpop.f32.mrb[14].mxu1 }
 0x1e9   : > { %v1429_v41 = vpop.f32.mrb[15].mxu1 }
 0x1ed   : > { %v4483_v45 = vpop.f32.mrb[0].mxu0 }
 0x1ee   : > { %v4833_v51 = vadd.f32 %v4483_v45, %v4083_v47  ;;  %v2890_v37 = vpop.f32.mrb[1].mxu0 }
 0x1ef   : > { %v4834_v52 = vadd.f32 %v2890_v37, %v1359_v56 }
 0x1f0   : > { %3082 = vst [vmem:[%s6241_s21 + $0x8] sm:$0xff] %v4833_v51 }
 0x1f1   : > { %3081 = vst [vmem:[%s6241_s21] sm:$0xff] %v4834_v52  ;;  %v4486_v57 = vpop.f32.mrb[2].mxu0 }
 0x1f2   : > { %v4835_v26 = vadd.f32 %v4486_v57, %v4086_v16  ;;  %v2900_v59 = vpop.f32.mrb[3].mxu0 }
 0x1f3   : > { %v4836_v2 = vadd.f32 %v2900_v59, %v1369_v63 }
 0x1f4   : > { %3084 = vst [vmem:[%s6241_s21 + $0x18] sm:$0xff] %v4835_v26 }
 0x1f5   : > { %3083 = vst [vmem:[%s6241_s21 + $0x10] sm:$0xff] %v4836_v2  ;;  %v4489_v29 = vpop.f32.mrb[4].mxu0 }
 0x1f6   : > { %v4837_v3 = vadd.f32 %v4489_v29, %v4089_v32  ;;  %v2910_v13 = vpop.f32.mrb[5].mxu0 }
 0x1f7   : > { %v4838_v30 = vadd.f32 %v2910_v13, %v1379_v60 }
 0x1f8   : > { %3086 = vst [vmem:[%s6241_s21 + $0x28] sm:$0xff] %v4837_v3 }
 0x1f9   : > { %3085 = vst [vmem:[%s6241_s21 + $0x20] sm:$0xff] %v4838_v30  ;;  %v4492_v14 = vpop.f32.mrb[6].mxu0 }
 0x1fa   : > { %v4839_v18 = vadd.f32 %v4492_v14, %v4092_v21  ;;  %v2920_v12 = vpop.f32.mrb[7].mxu0 }
 0x1fb   : > { %v4840_v31 = vadd.f32 %v2920_v12, %v1389_v44 }
 0x1fc   : > { %3088 = vst [vmem:[%s6241_s21 + $0x38] sm:$0xff] %v4839_v18 }
 0x1fd   : > { %3087 = vst [vmem:[%s6241_s21 + $0x30] sm:$0xff] %v4840_v31  ;;  %v4495_v20 = vpop.f32.mrb[8].mxu0 }
 0x1fe   : > { %v4841_v38 = vadd.f32 %v4495_v20, %v4095_v46  ;;  %v2930_v17 = vpop.f32.mrb[9].mxu0 }
 0x1ff   : > { %v4842_v48 = vadd.f32 %v2930_v17, %v1399_v25 }
 0x200   : > { %3090 = vst [vmem:[%s6241_s21 + $0x48] sm:$0xff] %v4841_v38 }
 0x201   : > { %3089 = vst [vmem:[%s6241_s21 + $0x40] sm:$0xff] %v4842_v48  ;;  %v4498_v53 = vpop.f32.mrb[10].mxu0 }
 0x202   : > { %v4843_v6 = vadd.f32 %v4498_v53, %v4098_v28  ;;  %v2940_v4 = vpop.f32.mrb[11].mxu0 }
 0x203   : > { %v4844_v11 = vadd.f32 %v2940_v4, %v1409_v39 }
 0x204   : > { %3092 = vst [vmem:[%s6241_s21 + $0x58] sm:$0xff] %v4843_v6 }
 0x205   : > { %3091 = vst [vmem:[%s6241_s21 + $0x50] sm:$0xff] %v4844_v11  ;;  %v4501_v15 = vpop.f32.mrb[12].mxu0 }
 0x206   : > { %v4845_v34 = vadd.f32 %v4501_v15, %v4101_v55  ;;  %v2950_v7 = vpop.f32.mrb[13].mxu0 }
 0x207   : > { %v4846_v49 = vadd.f32 %v2950_v7, %v1419_v43 }
 0x208   : > { %3094 = vst [vmem:[%s6241_s21 + $0x68] sm:$0xff] %v4845_v34 }
 0x209   : > { %3093 = vst [vmem:[%s6241_s21 + $0x60] sm:$0xff] %v4846_v49  ;;  %v4504_v33 = vpop.f32.mrb[14].mxu0 }
 0x20a   : > { %v4847_v9 = vadd.f32 %v4504_v33, %v4104_v0  ;;  %v2960_v10 = vpop.f32.mrb[15].mxu0 }
 0x20b   : > { %v4848_v22 = vadd.f32 %v2960_v10, %v1429_v41 }
 0x20c   : > { %3096 = vst [vmem:[%s6241_s21 + $0x78] sm:$0xff] %v4847_v9  ;;  %v4187_v23 = vpop.f32.mrb[16].mxu1 }
 0x20d   : > { %3095 = vst [vmem:[%s6241_s21 + $0x70] sm:$0xff] %v4848_v22  ;;  %v4507_v42 = vpop.f32.mrb[16].mxu0  ;;  %v1745_v58 = vpop.f32.mrb[17].mxu1 }
 0x20e   : > { %v4849_v35 = vadd.f32 %v4507_v42, %v4187_v23  ;;  %v2970_v36 = vpop.f32.mrb[17].mxu0 }
 0x20f   : > { %v4850_v50 = vadd.f32 %v2970_v36, %v1745_v58 }
 0x210   : > { %3098 = vst [vmem:[%s6241_s21 + $0x88] sm:$0xff] %v4849_v35  ;;  %v4190_v1 = vpop.f32.mrb[18].mxu1 }
 0x211   : > { %3097 = vst [vmem:[%s6241_s21 + $0x80] sm:$0xff] %v4850_v50  ;;  %v4510_v61 = vpop.f32.mrb[18].mxu0  ;;  %v1755_v5 = vpop.f32.mrb[19].mxu1 }
 0x212   : > { %v4851_v62 = vadd.f32 %v4510_v61, %v4190_v1  ;;  %v2980_v8 = vpop.f32.mrb[19].mxu0 }
 0x213   : > { %v4852_v24 = vadd.f32 %v2980_v8, %v1755_v5 }
 0x214   : > { %3100 = vst [vmem:[%s6241_s21 + $0x98] sm:$0xff] %v4851_v62  ;;  %v4193_v19 = vpop.f32.mrb[20].mxu1 }
 0x215   : > { %3099 = vst [vmem:[%s6241_s21 + $0x90] sm:$0xff] %v4852_v24  ;;  %v4513_v27 = vpop.f32.mrb[20].mxu0  ;;  %v1765_v40 = vpop.f32.mrb[21].mxu1 }
 0x216   : > { %v4853_v54 = vadd.f32 %v4513_v27, %v4193_v19  ;;  %v2990_v47 = vpop.f32.mrb[21].mxu0 }
 0x217   : > { %v4854_v56 = vadd.f32 %v2990_v47, %v1765_v40 }
 0x218   : > { %3102 = vst [vmem:[%s6241_s21 + $0xa8] sm:$0xff] %v4853_v54  ;;  %v4196_v16 = vpop.f32.mrb[22].mxu1 }
 0x219   : > { %3101 = vst [vmem:[%s6241_s21 + $0xa0] sm:$0xff] %v4854_v56  ;;  %v4516_v63 = vpop.f32.mrb[22].mxu0  ;;  %v1775_v32 = vpop.f32.mrb[23].mxu1 }
 0x21a   : > { %v4855_v60 = vadd.f32 %v4516_v63, %v4196_v16  ;;  %v3000_v21 = vpop.f32.mrb[23].mxu0 }
 0x21b   : > { %v4856_v44 = vadd.f32 %v3000_v21, %v1775_v32 }
 0x21c   : > { %3104 = vst [vmem:[%s6241_s21 + $0xb8] sm:$0xff] %v4855_v60  ;;  %v4199_v46 = vpop.f32.mrb[24].mxu1 }
 0x21d   : > { %3103 = vst [vmem:[%s6241_s21 + $0xb0] sm:$0xff] %v4856_v44  ;;  %v4519_v25 = vpop.f32.mrb[24].mxu0  ;;  %v1785_v28 = vpop.f32.mrb[25].mxu1 }
 0x21e   : > { %v4857_v39 = vadd.f32 %v4519_v25, %v4199_v46  ;;  %v3010_v55 = vpop.f32.mrb[25].mxu0 }
 0x21f   : > { %v4858_v43 = vadd.f32 %v3010_v55, %v1785_v28 }
 0x220   : > { %3106 = vst [vmem:[%s6241_s21 + $0xc8] sm:$0xff] %v4857_v39  ;;  %v4202_v0 = vpop.f32.mrb[26].mxu1 }
 0x221   : > { %3105 = vst [vmem:[%s6241_s21 + $0xc0] sm:$0xff] %v4858_v43  ;;  %v4522_v41 = vpop.f32.mrb[26].mxu0  ;;  %v1795_v45 = vpop.f32.mrb[27].mxu1 }
 0x222   : > { %v4859_v51 = vadd.f32 %v4522_v41, %v4202_v0  ;;  %v3020_v37 = vpop.f32.mrb[27].mxu0 }
 0x223   : > { %v4860_v52 = vadd.f32 %v3020_v37, %v1795_v45 }
 0x224   : > { %3108 = vst [vmem:[%s6241_s21 + $0xd8] sm:$0xff] %v4859_v51  ;;  %v4205_v57 = vpop.f32.mrb[28].mxu1 }
 0x225   : > { %3107 = vst [vmem:[%s6241_s21 + $0xd0] sm:$0xff] %v4860_v52  ;;  %v4525_v26 = vpop.f32.mrb[28].mxu0  ;;  %v1805_v59 = vpop.f32.mrb[29].mxu1 }
 0x226   : > { %v4861_v2 = vadd.f32 %v4525_v26, %v4205_v57  ;;  %v3030_v29 = vpop.f32.mrb[29].mxu0 }
 0x227   : > { %v4862_v3 = vadd.f32 %v3030_v29, %v1805_v59 }
 0x228   : > { %3110 = vst [vmem:[%s6241_s21 + $0xe8] sm:$0xff] %v4861_v2  ;;  %v4208_v13 = vpop.f32.mrb[30].mxu1 }
 0x229   : > { %3109 = vst [vmem:[%s6241_s21 + $0xe0] sm:$0xff] %v4862_v3  ;;  %v4528_v30 = vpop.f32.mrb[30].mxu0  ;;  %v1815_v14 = vpop.f32.mrb[31].mxu1 }
 0x22a   : > { %v4863_v18 = vadd.f32 %v4528_v30, %v4208_v13  ;;  %v3040_v12 = vpop.f32.mrb[31].mxu0 }
 0x22b   : > { %v4864_v31 = vadd.f32 %v3040_v12, %v1815_v14 }
 0x22c   : > { %3112 = vst [vmem:[%s6241_s21 + $0xf8] sm:$0xff] %v4863_v18 }
 0x22d   : > { %3111 = vst [vmem:[%s6241_s21 + $0xf0] sm:$0xff] %v4864_v31 }
 0x22e   : > { %5164 = shalt.err (!%p5161_p5)
}
 0x22f   : > { %s5165_s19 = scalar_lea.hbm %s6278_s4, 4096  ;;  %s5169_s18 = scalar_lea.hbm %s6335_s3, 8192 }
 0x230   : > { %p5166_p6 = scmp.ne.s32.totalorder %s6278_s4, %s5165_s19  ;;  %p5170_p10 = scmp.lt.u32.totalorder %s6278_s4, %s6335_s3 }
 0x231   : > { %p5171_p11 = scmp.lt.u32.totalorder %s5169_s18, %s5165_s19  ;;  %p5173_p13 = scmp.lt.u32.totalorder %s5165_s19, %s6278_s4 }
 0x232   : > { %p5167_p7 = pnand %p5166_p6, %p5294_p4 }
 0x233   : > { %p5172_p12 = por %p5171_p11, %p5170_p10 }
 0x234   : > { %p5168_p9 = pneg %p5167_p7 }
 0x235   : > { %p5174_p0 = por %p5173_p13, %p5172_p12 }
 0x237   : > { %p5175_p1 = pnand %p5174_p0, %p5168_p9 }
 0x239   : > { %5178 = shalt.err (!%p5175_p1)
}
 0x23a   : > { %s5232_s7 = smov 128   ;;  %s5233_s21 = smov 8  }
 0x23b   : > { %5091 = dma.vmem_to_hbm [thread:$0]  (%p5294_p4), %s6280_s26, 4096, %s6278_s4, %s6286_s15, %s5232_s7, %s5232_s7, %s5233_s21  }
 0x23c PF: > { %p5098_p2 = scmp.ge.s32.totalorder %s5229_s17, 2  ;;  %s3145_s23 = sand.u32 1, %s5209_s12  }
 0x23d   : > { %s3146_s28 = scalar_lea.sflag [#allocation4], %s3145_s23 }
 0x23e   : > { %p5094_p3 = pnand %p5098_p2, %p5301_p8 }
 0x240   : > { %5204 = dma.done.wait (!%p5094_p3), %s3146_s28, 4096  }
 0x241   : > { %5206 = vsyncadd (!%p5094_p3), %s3146_s28, 4294963200  ;;  %s16_s17 = sadd.s32 1, %s5229_s17   ;;  %s6405_s12 = smov %s5213_s13 }
 0x242   : > { %p13_p5 = scmp.ge.s32.totalorder %s16_s17, 4   ;;  %s6406_s13 = smov %s5217_s14 }
 0x243   : > { %s6407_s14 = smov %s5307_s25  ;;  %s6408_s15 = smov %s5225_s16 }
 0x244   : > { %s6409_s16 = smov %s6411_s20  ;;  %15 = sbr.rel (!%p13_p5) target bundleno = 4 (0x4), region = 81 }
 0x24b   :  { %3151 = vsyncpa [#allocation4], 1 }
 0x24c   :  { %3153 = vsyncpa [#allocation4 + $0x1], 1 }

</bundles_post_ra>
